<compile_context>
chip_gen: v7x
topology: tpu7x:2x2x1
jax: 0.10.0
libtpu: 0.0.40
codegen_flags: <defaults>
</compile_context>

<pallas_src>
import math
import functools

import jax
import jax.numpy as jnp
import numpy as np
from jax import lax
from jax.experimental import pallas as pl
from jax.experimental.pallas import tpu as pltpu


def _round_up(v, m):
    return -(-v // m) * m


def _num_tensorcores() -> int:
    """TensorCores per chip: v7x exposes 2, v5e/v6e have 1."""
    try:
        kind = jax.devices()[0].device_kind.lower()
    except Exception:
        return 1
    return 2 if "v7" in kind else 1


def _sngp_kernel(x_ref, w_out_ref, b_out_ref, w_beta_ref, b_beta_ref,
                 logits_ref, phiphi_ref, *, n_valid, tile_rows, mask_rows):
    p = pl.program_id(0)          # "parallel" chunk (one per TensorCore on v7x)
    s = pl.program_id(1)          # "arbitrary" reduction steps within the chunk

    # PhiPhi partial for this chunk is resident across the reduction axis.
    @pl.when(s == 0)
    def _():
        phiphi_ref[...] = jnp.zeros_like(phiphi_ref)

    # cos(x @ (-W_out^T) + b_out).  The RFF `scale` is folded into W_beta /
    # re-applied to PhiPhi in the wrapper, so no per-tile scale multiply here.
    x_bf = x_ref[...].astype(jnp.bfloat16)            # f32 -> bf16 cast in-kernel
    pre = jnp.dot(x_bf, w_out_ref[...],
                  preferred_element_type=jnp.float32) + b_out_ref[...]   # [TN, Op]
    c = jnp.cos(pre)                                   # unit-scale Phi, f32
    c_bf = c.astype(jnp.bfloat16)

    # logits = Phi @ (scale * W_beta^T) + b_beta.
    # INVARIANT: padded logit columns carry bias -1e30; this is only safe
    # because p_max below is computed via f32 max + logsumexp (no softmax).
    logits = jnp.dot(c_bf, w_beta_ref[...],
                     preferred_element_type=jnp.float32) + b_beta_ref[...]
    logits_ref[...] = logits.astype(logits_ref.dtype)

    # p_max via max + logsumexp (EUP exp/log), no [TN, Op] probs temporary.
    m = jnp.max(logits, axis=-1, keepdims=True)                          # [TN, 1]
    lse = m + jnp.log(jnp.sum(jnp.exp(logits - m), axis=-1, keepdims=True))
    max_prob = jnp.exp(m - lse)
    w = max_prob * (1.0 - max_prob)                                      # [TN, 1]

    if mask_rows:
        # Zero the Gram weight of zero-padded rows so they never touch PhiPhi.
        row0 = (p * pl.num_programs(1) + s) * tile_rows
        rows = row0 + lax.broadcasted_iota(jnp.int32, (tile_rows, 1), 0)
        w = jnp.where(rows < n_valid, w, 0.0)

    # Weighted Gram: contract rows of both operands on the MXU directly
    # (no explicit XLU transpose of the [TN, Op] tile).
    contrib = lax.dot_general(
        (c * w).astype(jnp.bfloat16), c_bf,
        dimension_numbers=(((0,), (0,)), ((), ())),
        preferred_element_type=jnp.float32)                              # [Op, Op]
    phiphi_ref[...] += contrib


def sngp_forward(x, w_out, b_out, w_beta, b_beta, *, kernel_amplitude,
                 tile_rows=1024, logits_dtype=jnp.bfloat16):
    """x: [B, S, H]. Returns (logits [B, S, O] logits_dtype, PhiPhi [O, O] f32)."""
    B, S, H = x.shape
    O = w_out.shape[0]
    N = B * S
    scale = math.sqrt(2.0 * kernel_amplitude ** 2 / O)

    # Lane-dense output width.  Do NOT pad beyond one 128-lane multiple: the
    # kernel is HBM-bound, wider O only adds FLOPs and logits bytes.
    O_pad = _round_up(O, 128)

    num_tc = _num_tensorcores()

    # Row tile: as big as the VMEM working set allows (amortises the ~0.35us
    # per-step pipeline overhead); capped so double-buffering survives the
    # 64 MiB/TC physical VMEM on v7x.
    tile_rows = max(8, (min(tile_rows, _round_up(N, 8)) // 8) * 8)
    logit_bytes = np.dtype(logits_dtype).itemsize

    def _working_set(t):
        return (2 * t * H * x.dtype.itemsize          # x tiles (double buffer)
                + 2 * t * O_pad * logit_bytes          # logits tiles
                + 6 * t * O_pad * 4                    # in-kernel f32 temporaries
                + 2 * (H + O_pad) * O_pad * 2          # bf16 weights (<=2 bufs)
                + O_pad * O_pad * 4)                   # resident PhiPhi accum
    vmem_budget = 40 * 1024 * 1024
    while tile_rows > 128 and _working_set(tile_rows) > vmem_budget:
        tile_rows = max(128, ((tile_rows // 2) // 8) * 8)

    num_tiles = -(-N // tile_rows)
    num_chunks = num_tc if num_tiles >= num_tc else 1   # 1 on v5e/v6e, 2 on v7x
    steps = -(-num_tiles // num_chunks)
    n_pad = num_chunks * steps * tile_rows

    # Feed x straight through (reshape is free); no wrapper-side pad+cast pass.
    # The f32->bf16 cast happens in-kernel; padding only when N is ragged.
    x2d = x.reshape(N, H)
    if n_pad != N:
        x2d = jnp.pad(x2d, ((0, n_pad - N), (0, 0)))

    f32 = jnp.float32
    # Negation folded into the pre-transposed frozen output weight.
    w_out_neg_t = jnp.pad((-jnp.asarray(w_out, f32).T).astype(jnp.bfloat16),
                          ((0, 0), (0, O_pad - O)))                     # [H, Op]
    b_out_p = jnp.pad(jnp.asarray(b_out, f32).reshape(1, O),
                      ((0, 0), (0, O_pad - O)))
    # RFF scale folded into W_beta (and re-applied to PhiPhi as scale^2 below).
    w_beta_scaled_t = jnp.pad(
        (scale * jnp.asarray(w_beta, f32).T).astype(jnp.bfloat16),      # [Op, Op]
        ((0, O_pad - O), (0, O_pad - O)))
    # Padded logit columns: bias -1e30 so they never win the f32 max/logsumexp.
    b_beta_p = jnp.pad(jnp.asarray(b_beta, f32).reshape(1, O),
                       ((0, 0), (0, O_pad - O)), constant_values=-1e30)

    kernel = functools.partial(_sngp_kernel, n_valid=N, tile_rows=tile_rows,
                               mask_rows=(n_pad != N))
    grid = (num_chunks, steps)

    def _call(single_buffer_weights):
        def wspec(shape):
            if single_buffer_weights:
                # Grid-invariant operands: one VMEM buffer is enough.
                return pl.BlockSpec(shape, lambda p, s: (0, 0),
                                    pipeline_mode=pl.Buffered(1))
            return pl.BlockSpec(shape, lambda p, s: (0, 0))

        return pl.pallas_call(
            kernel,
            out_shape=(
                jax.ShapeDtypeStruct((n_pad, O_pad), logits_dtype),
                jax.ShapeDtypeStruct((num_chunks, O_pad, O_pad), jnp.float32),
            ),
            grid_spec=pltpu.PrefetchScalarGridSpec(
                num_scalar_prefetch=0,
                grid=grid,
                in_specs=[
                    pl.BlockSpec((tile_rows, H), lambda p, s: (p * steps + s, 0)),
                    wspec((H, O_pad)),          # -W_out^T (bf16)
                    wspec((1, O_pad)),          # b_out
                    wspec((O_pad, O_pad)),      # scale * W_beta^T (bf16)
                    wspec((1, O_pad)),          # b_beta (-1e30 in padded cols)
                ],
                out_specs=[
                    pl.BlockSpec((tile_rows, O_pad),
                                 lambda p, s: (p * steps + s, 0)),
                    pl.BlockSpec((None, O_pad, O_pad), lambda p, s: (p, 0, 0)),
                ],
            ),
            compiler_params=pltpu.CompilerParams(
                dimension_semantics=("parallel", "arbitrary"),
                vmem_limit_bytes=48 * 1024 * 1024,   # under v7x 64 MiB/TC physical
            ),
        )(x2d, w_out_neg_t, b_out_p, w_beta_scaled_t, b_beta_p)

    try:
        logits_pad, phiphi_parts = _call(single_buffer_weights=True)
    except Exception:
        # pl.Buffered(1) on invariant operands is a pure-VMEM optimisation;
        # fall back to default double buffering if this JAX version rejects it.
        logits_pad, phiphi_parts = _call(single_buffer_weights=False)

    phiphi = phiphi_parts[0] if num_chunks == 1 else jnp.sum(phiphi_parts, axis=0)
    phiphi = (scale * scale) * phiphi[:O, :O]

    if n_pad == N and O_pad == O:
        logits = logits_pad.reshape(B, S, O)
    else:
        # TODO(synk): a fused consumer should read the padded [n_pad, O_pad]
        # buffer directly; this standalone slice costs one extra HBM pass.
        logits = logits_pad[:N, :O].reshape(B, S, O)
    return logits, phiphi


def sngp_reference(x, w_out, b_out, w_beta, b_beta, kernel_amplitude):
    """Plain-JAX reference of the PyTorch forward (training branch), mirroring
    the kernel's bf16 operand rounding / scale folding so results compare."""
    O = w_out.shape[0]
    scale = math.sqrt(2.0 * kernel_amplitude ** 2 / O)
    f32 = jnp.float32
    xb = x.astype(jnp.bfloat16).astype(f32)
    wob = jnp.asarray(w_out, f32).astype(jnp.bfloat16).astype(f32)
    wbb = (scale * jnp.asarray(w_beta, f32)).astype(jnp.bfloat16).astype(f32)

    c = jnp.cos(jnp.einsum("bsh,oh->bso", -xb, wob) + b_out)   # unit-scale Phi
    cb = c.astype(jnp.bfloat16).astype(f32)
    logits = jnp.einsum("bso,po->bsp", cb, wbb) + b_beta
    probs = jax.nn.softmax(logits, axis=-1)
    mp = jnp.max(probs, axis=-1)
    w = mp * (1.0 - mp)
    cw = (c * w[..., None]).astype(jnp.bfloat16).astype(f32)
    phiphi = (scale * scale) * jnp.einsum("bso,bsp->op", cw, cb)
    return logits, phiphi


if __name__ == "__main__":
    # Module hyperparameters (small shapes consistent with the b x s x h forward).
    batch, seq, hidden_size, output_size = 2, 8, 32, 8
    ridge_factor = 0.001
    scaling_coefficient = 0.999
    beta_length_scale = 0.5
    kernel_amplitude = 1.0

    key = jax.random.PRNGKey(0)
    kx, kw1, kb1, kw2 = jax.random.split(key, 4)

    # Deterministic parameter init matching the PyTorch __init__ distributions.
    w_out = 0.05 * jax.random.normal(kw1, (output_size, hidden_size), jnp.float32)
    b_out = jax.random.uniform(kb1, (output_size,), jnp.float32,
                               minval=0.0, maxval=2.0 * math.pi)
    w_beta = beta_length_scale * jax.random.normal(kw2, (output_size, output_size),
                                                   jnp.float32)
    b_beta = jnp.zeros((output_size,), jnp.float32)
    sigma_hat_inv = jnp.eye(output_size, dtype=jnp.float32) * beta_length_scale

    x = jax.random.normal(kx, (batch, seq, hidden_size), jnp.float32)

    logits, phiphi = sngp_forward(x, w_out, b_out, w_beta, b_beta,
                                  kernel_amplitude=kernel_amplitude)
    logits = jax.block_until_ready(logits)
    phiphi = jax.block_until_ready(phiphi)

    # Training-mode state update (glue, as in the PyTorch no_grad block).
    sigma_hat_inv_new = (scaling_coefficient * sigma_hat_inv
                         + (1.0 - scaling_coefficient) * phiphi)
    jax.block_until_ready(sigma_hat_inv_new)
    # TODO(synk): predict/get_logits (sigma_hat inversion + MVN beta sampling)
    # are host-side linear algebra / sampling, not kernelized here.

    # Correctness check against a plain-JAX reference of the PyTorch semantics.
    ref_logits, ref_phiphi = sngp_reference(x, w_out, b_out, w_beta, b_beta,
                                            kernel_amplitude)
    ref_logits_cast = ref_logits.astype(logits.dtype).astype(jnp.float32)
    assert jnp.allclose(logits.astype(jnp.float32), ref_logits_cast,
                        rtol=1e-2, atol=1e-2), (
        float(jnp.max(jnp.abs(logits.astype(jnp.float32) - ref_logits_cast))))
    assert jnp.allclose(phiphi, ref_phiphi, rtol=2e-3, atol=2e-3), (
        float(jnp.max(jnp.abs(phiphi - ref_phiphi))))

    print("KERNEL_OK")
</pallas_src>

<mosaic_0001>
module attributes {stable_mosaic.version = 11 : i64} {
  func.func @_sngp_kernel(%arg0: i32, %arg1: i32, %arg2: memref<16x32xf32, #tpu.memory_space<vmem>>, %arg3: memref<32x128xbf16, #tpu.memory_space<vmem>>, %arg4: memref<1x128xf32, #tpu.memory_space<vmem>>, %arg5: memref<128x128xbf16, #tpu.memory_space<vmem>>, %arg6: memref<1x128xf32, #tpu.memory_space<vmem>>, %arg7: memref<16x128xbf16, #tpu.memory_space<vmem>>, %arg8: memref<1x128x128xf32, #tpu.memory_space<vmem>>) attributes {dimension_semantics = [#tpu.dimension_semantics<parallel>, #tpu.dimension_semantics<arbitrary>], iteration_bounds = array<i64: 1, 1>, scalar_prefetch = 0 : i64, scratch_operands = 0 : i64, tpu.core_type = #tpu.core_type<tc>, window_params = [{transform_indices = @transform_0, window_bounds = array<i64: 16, 32>}, {pipeline_mode = #tpu.pipeline_mode<synchronous>, transform_indices = @transform_1, window_bounds = array<i64: 32, 128>}, {pipeline_mode = #tpu.pipeline_mode<synchronous>, transform_indices = @transform_2, window_bounds = array<i64: 1, 128>}, {pipeline_mode = #tpu.pipeline_mode<synchronous>, transform_indices = @transform_3, window_bounds = array<i64: 128, 128>}, {pipeline_mode = #tpu.pipeline_mode<synchronous>, transform_indices = @transform_4, window_bounds = array<i64: 1, 128>}, {transform_indices = @transform_5, window_bounds = array<i64: 16, 128>}, {transform_indices = @transform_6, window_bounds = array<i64: 1, 128, 128>}]} {
    %c0_i32 = arith.constant 0 : i32
    %0 = arith.cmpi eq, %arg1, %c0_i32 : i32
    %1 = arith.extui %0 : i1 to i32
    %c0_i32_0 = arith.constant 0 : i32
    %2 = arith.cmpi ne, %1, %c0_i32_0 : i32
    scf.if %2 {
      %cst_23 = arith.constant 0.000000e+00 : f32
      %43 = vector.broadcast %cst_23 : f32 to vector<128x128xf32>
      %c0_24 = arith.constant 0 : index
      %c0_25 = arith.constant 0 : index
      %c0_26 = arith.constant 0 : index
      %44 = vector.load %arg8[%c0_24, %c0_25, %c0_26] : memref<1x128x128xf32, #tpu.memory_space<vmem>>, vector<1x128x128xf32>
      %45 = vector.shape_cast %44 : vector<1x128x128xf32> to vector<128x128xf32>
      %46 = vector.shape_cast %43 : vector<128x128xf32> to vector<1x128x128xf32>
      tpu.vector_store %arg8[%c0_24, %c0_25, %c0_26], %46 {strides = array<i32>} : memref<1x128x128xf32, #tpu.memory_space<vmem>>, vector<1x128x128xf32>,
    } else {
    }
    %c0 = arith.constant 0 : index
    %c0_1 = arith.constant 0 : index
    %3 = vector.load %arg2[%c0, %c0_1] : memref<16x32xf32, #tpu.memory_space<vmem>>, vector<16x32xf32>
    %4 = arith.truncf %3 : vector<16x32xf32> to vector<16x32xbf16>
    %c0_2 = arith.constant 0 : index
    %c0_3 = arith.constant 0 : index
    %5 = vector.load %arg3[%c0_2, %c0_3] : memref<32x128xbf16, #tpu.memory_space<vmem>>, vector<32x128xbf16>
    %cst = arith.constant dense<0.000000e+00> : vector<16x128xf32>
    %6 = tpu.matmul %4, %5, %cst {dimension_numbers = #tpu.dot_dimension_numbers<[1], [0], [0], [1], [0, 0, 1, 1], [], []>} : vector<16x32xbf16>, vector<32x128xbf16>, vector<16x128xf32> -> vector<16x128xf32>
    %c0_4 = arith.constant 0 : index
    %c0_5 = arith.constant 0 : index
    %7 = vector.load %arg4[%c0_4, %c0_5] : memref<1x128xf32, #tpu.memory_space<vmem>>, vector<1x128xf32>
    %8 = vector.broadcast %7 : vector<1x128xf32> to vector<16x128xf32>
    %9 = arith.addf %6, %8 : vector<16x128xf32>
    %10 = math.cos %9 : vector<16x128xf32>
    %11 = arith.truncf %10 : vector<16x128xf32> to vector<16x128xbf16>
    %c0_6 = arith.constant 0 : index
    %c0_7 = arith.constant 0 : index
    %12 = vector.load %arg5[%c0_6, %c0_7] : memref<128x128xbf16, #tpu.memory_space<vmem>>, vector<128x128xbf16>
    %cst_8 = arith.constant dense<0.000000e+00> : vector<16x128xf32>
    %13 = tpu.matmul %11, %12, %cst_8 {dimension_numbers = #tpu.dot_dimension_numbers<[1], [0], [0], [1], [0, 0, 1, 1], [], []>} : vector<16x128xbf16>, vector<128x128xbf16>, vector<16x128xf32> -> vector<16x128xf32>
    %c0_9 = arith.constant 0 : index
    %c0_10 = arith.constant 0 : index
    %14 = vector.load %arg6[%c0_9, %c0_10] : memref<1x128xf32, #tpu.memory_space<vmem>>, vector<1x128xf32>
    %15 = vector.broadcast %14 : vector<1x128xf32> to vector<16x128xf32>
    %16 = arith.addf %13, %15 : vector<16x128xf32>
    %17 = arith.truncf %16 : vector<16x128xf32> to vector<16x128xbf16>
    %c0_11 = arith.constant 0 : index
    %c0_12 = arith.constant 0 : index
    %18 = vector.load %arg7[%c0_11, %c0_12] : memref<16x128xbf16, #tpu.memory_space<vmem>>, vector<16x128xbf16>
    tpu.vector_store %arg7[%c0_11, %c0_12], %17 {strides = array<i32>} : memref<16x128xbf16, #tpu.memory_space<vmem>>, vector<16x128xbf16>,
    %cst_13 = arith.constant dense<0xFF800000> : vector<16xf32>
    %19 = vector.multi_reduction <maximumf>, %16, %cst_13 [1] : vector<16x128xf32> to vector<16xf32>
    %20 = vector.shape_cast %19 : vector<16xf32> to vector<16x1xf32>
    %21 = vector.broadcast %20 : vector<16x1xf32> to vector<16x128xf32>
    %22 = arith.subf %16, %21 : vector<16x128xf32>
    %23 = math.exp %22 : vector<16x128xf32>
    %cst_14 = arith.constant dense<0.000000e+00> : vector<16xf32>
    %24 = vector.multi_reduction <add>, %23, %cst_14 [1] : vector<16x128xf32> to vector<16xf32>
    %25 = vector.shape_cast %24 : vector<16xf32> to vector<16x1xf32>
    %26 = math.log %25 : vector<16x1xf32>
    %27 = arith.addf %20, %26 : vector<16x1xf32>
    %28 = arith.subf %20, %27 : vector<16x1xf32>
    %29 = math.exp %28 : vector<16x1xf32>
    %cst_15 = arith.constant 1.000000e+00 : f32
    %30 = vector.broadcast %cst_15 : f32 to vector<16x1xf32>
    %31 = arith.subf %30, %29 : vector<16x1xf32>
    %32 = arith.mulf %29, %31 : vector<16x1xf32>
    %33 = vector.broadcast %32 : vector<16x1xf32> to vector<16x128xf32>
    %34 = arith.mulf %10, %33 : vector<16x128xf32>
    %35 = arith.truncf %34 : vector<16x128xf32> to vector<16x128xbf16>
    %cst_16 = arith.constant dense<0.000000e+00> : vector<128x128xf32>
    %36 = tpu.matmul %35, %11, %cst_16 {dimension_numbers = #tpu.dot_dimension_numbers<[0], [0], [1], [1], [0, 1, 1, 1], [], []>} : vector<16x128xbf16>, vector<16x128xbf16>, vector<128x128xf32> -> vector<128x128xf32>
    %c0_17 = arith.constant 0 : index
    %c0_18 = arith.constant 0 : index
    %c0_19 = arith.constant 0 : index
    %37 = vector.load %arg8[%c0_17, %c0_18, %c0_19] : memref<1x128x128xf32, #tpu.memory_space<vmem>>, vector<1x128x128xf32>
    %38 = vector.shape_cast %37 : vector<1x128x128xf32> to vector<128x128xf32>
    %39 = arith.addf %38, %36 : vector<128x128xf32>
    %c0_20 = arith.constant 0 : index
    %c0_21 = arith.constant 0 : index
    %c0_22 = arith.constant 0 : index
    %40 = vector.load %arg8[%c0_20, %c0_21, %c0_22] : memref<1x128x128xf32, #tpu.memory_space<vmem>>, vector<1x128x128xf32>
    %41 = vector.shape_cast %40 : vector<1x128x128xf32> to vector<128x128xf32>
    %42 = vector.shape_cast %39 : vector<128x128xf32> to vector<1x128x128xf32>
    tpu.vector_store %arg8[%c0_20, %c0_21, %c0_22], %42 {strides = array<i32>} : memref<1x128x128xf32, #tpu.memory_space<vmem>>, vector<1x128x128xf32>,
    return
  }
  func.func @transform_0(%arg0: i32, %arg1: i32) -> (i32, i32) {
    %c1_i32 = arith.constant 1 : i32
    %0 = arith.muli %arg0, %c1_i32 : i32
    %1 = arith.addi %0, %arg1 : i32
    %c0_i32 = arith.constant 0 : i32
    %c0_i32_0 = arith.constant 0 : i32
    return %1, %c0_i32 : i32, i32
  }
  func.func @transform_1(%arg0: i32, %arg1: i32) -> (i32, i32) {
    %c0_i32 = arith.constant 0 : i32
    %c0_i32_0 = arith.constant 0 : i32
    %c0_i32_1 = arith.constant 0 : i32
    return %c0_i32, %c0_i32_0 : i32, i32
  }
  func.func @transform_2(%arg0: i32, %arg1: i32) -> (i32, i32) {
    %c0_i32 = arith.constant 0 : i32
    %c0_i32_0 = arith.constant 0 : i32
    %c0_i32_1 = arith.constant 0 : i32
    return %c0_i32, %c0_i32_0 : i32, i32
  }
  func.func @transform_3(%arg0: i32, %arg1: i32) -> (i32, i32) {
    %c0_i32 = arith.constant 0 : i32
    %c0_i32_0 = arith.constant 0 : i32
    %c0_i32_1 = arith.constant 0 : i32
    return %c0_i32, %c0_i32_0 : i32, i32
  }
  func.func @transform_4(%arg0: i32, %arg1: i32) -> (i32, i32) {
    %c0_i32 = arith.constant 0 : i32
    %c0_i32_0 = arith.constant 0 : i32
    %c0_i32_1 = arith.constant 0 : i32
    return %c0_i32, %c0_i32_0 : i32, i32
  }
  func.func @transform_5(%arg0: i32, %arg1: i32) -> (i32, i32) {
    %c1_i32 = arith.constant 1 : i32
    %0 = arith.muli %arg0, %c1_i32 : i32
    %1 = arith.addi %0, %arg1 : i32
    %c0_i32 = arith.constant 0 : i32
    %c0_i32_0 = arith.constant 0 : i32
    return %1, %c0_i32 : i32, i32
  }
  func.func @transform_6(%arg0: i32, %arg1: i32) -> (i32, i32, i32) {
    %c0_i32 = arith.constant 0 : i32
    %c0_i32_0 = arith.constant 0 : i32
    %c0_i32_1 = arith.constant 0 : i32
    return %arg0, %c0_i32, %c0_i32_0 : i32, i32, i32
  }
}

module attributes {stable_mosaic.version = 11 : i64} {
  func.func @_sngp_kernel(%arg0: i32, %arg1: i32, %arg2: memref<16x32xf32, #tpu.memory_space<vmem>>, %arg3: memref<32x128xbf16, #tpu.memory_space<vmem>>, %arg4: memref<1x128xf32, #tpu.memory_space<vmem>>, %arg5: memref<128x128xbf16, #tpu.memory_space<vmem>>, %arg6: memref<1x128xf32, #tpu.memory_space<vmem>>, %arg7: memref<16x128xbf16, #tpu.memory_space<vmem>>, %arg8: memref<1x128x128xf32, #tpu.memory_space<vmem>>) attributes {dimension_semantics = [#tpu.dimension_semantics<parallel>, #tpu.dimension_semantics<arbitrary>], iteration_bounds = array<i64: 1, 1>, scalar_prefetch = 0 : i64, scratch_operands = 0 : i64, tpu.core_type = #tpu.core_type<tc>, window_params = [{transform_indices = @transform_0, window_bounds = array<i64: 16, 32>}, {pipeline_mode = #tpu.pipeline_mode<synchronous>, transform_indices = @transform_1, window_bounds = array<i64: 32, 128>}, {pipeline_mode = #tpu.pipeline_mode<synchronous>, transform_indices = @transform_2, window_bounds = array<i64: 1, 128>}, {pipeline_mode = #tpu.pipeline_mode<synchronous>, transform_indices = @transform_3, window_bounds = array<i64: 128, 128>}, {pipeline_mode = #tpu.pipeline_mode<synchronous>, transform_indices = @transform_4, window_bounds = array<i64: 1, 128>}, {transform_indices = @transform_5, window_bounds = array<i64: 16, 128>}, {transform_indices = @transform_6, window_bounds = array<i64: 1, 128, 128>}]} {
    %c0_i32 = arith.constant 0 : i32
    %0 = arith.cmpi eq, %arg1, %c0_i32 : i32
    %1 = arith.extui %0 : i1 to i32
    %c0_i32_0 = arith.constant 0 : i32
    %2 = arith.cmpi ne, %1, %c0_i32_0 : i32
    scf.if %2 {
      %cst_23 = arith.constant 0.000000e+00 : f32
      %43 = vector.broadcast %cst_23 : f32 to vector<128x128xf32>
      %c0_24 = arith.constant 0 : index
      %c0_25 = arith.constant 0 : index
      %c0_26 = arith.constant 0 : index
      %44 = vector.load %arg8[%c0_24, %c0_25, %c0_26] : memref<1x128x128xf32, #tpu.memory_space<vmem>>, vector<1x128x128xf32>
      %45 = vector.shape_cast %44 : vector<1x128x128xf32> to vector<128x128xf32>
      %46 = vector.shape_cast %43 : vector<128x128xf32> to vector<1x128x128xf32>
      tpu.vector_store %arg8[%c0_24, %c0_25, %c0_26], %46 {strides = array<i32>} : memref<1x128x128xf32, #tpu.memory_space<vmem>>, vector<1x128x128xf32>,
    } else {
    }
    %c0 = arith.constant 0 : index
    %c0_1 = arith.constant 0 : index
    %3 = vector.load %arg2[%c0, %c0_1] : memref<16x32xf32, #tpu.memory_space<vmem>>, vector<16x32xf32>
    %4 = arith.truncf %3 : vector<16x32xf32> to vector<16x32xbf16>
    %c0_2 = arith.constant 0 : index
    %c0_3 = arith.constant 0 : index
    %5 = vector.load %arg3[%c0_2, %c0_3] : memref<32x128xbf16, #tpu.memory_space<vmem>>, vector<32x128xbf16>
    %cst = arith.constant dense<0.000000e+00> : vector<16x128xf32>
    %6 = tpu.matmul %4, %5, %cst {dimension_numbers = #tpu.dot_dimension_numbers<[1], [0], [0], [1], [0, 0, 1, 1], [], []>} : vector<16x32xbf16>, vector<32x128xbf16>, vector<16x128xf32> -> vector<16x128xf32>
    %c0_4 = arith.constant 0 : index
    %c0_5 = arith.constant 0 : index
    %7 = vector.load %arg4[%c0_4, %c0_5] : memref<1x128xf32, #tpu.memory_space<vmem>>, vector<1x128xf32>
    %8 = vector.broadcast %7 : vector<1x128xf32> to vector<16x128xf32>
    %9 = arith.addf %6, %8 : vector<16x128xf32>
    %10 = math.cos %9 : vector<16x128xf32>
    %11 = arith.truncf %10 : vector<16x128xf32> to vector<16x128xbf16>
    %c0_6 = arith.constant 0 : index
    %c0_7 = arith.constant 0 : index
    %12 = vector.load %arg5[%c0_6, %c0_7] : memref<128x128xbf16, #tpu.memory_space<vmem>>, vector<128x128xbf16>
    %cst_8 = arith.constant dense<0.000000e+00> : vector<16x128xf32>
    %13 = tpu.matmul %11, %12, %cst_8 {dimension_numbers = #tpu.dot_dimension_numbers<[1], [0], [0], [1], [0, 0, 1, 1], [], []>} : vector<16x128xbf16>, vector<128x128xbf16>, vector<16x128xf32> -> vector<16x128xf32>
    %c0_9 = arith.constant 0 : index
    %c0_10 = arith.constant 0 : index
    %14 = vector.load %arg6[%c0_9, %c0_10] : memref<1x128xf32, #tpu.memory_space<vmem>>, vector<1x128xf32>
    %15 = vector.broadcast %14 : vector<1x128xf32> to vector<16x128xf32>
    %16 = arith.addf %13, %15 : vector<16x128xf32>
    %17 = arith.truncf %16 : vector<16x128xf32> to vector<16x128xbf16>
    %c0_11 = arith.constant 0 : index
    %c0_12 = arith.constant 0 : index
    %18 = vector.load %arg7[%c0_11, %c0_12] : memref<16x128xbf16, #tpu.memory_space<vmem>>, vector<16x128xbf16>
    tpu.vector_store %arg7[%c0_11, %c0_12], %17 {strides = array<i32>} : memref<16x128xbf16, #tpu.memory_space<vmem>>, vector<16x128xbf16>,
    %cst_13 = arith.constant dense<0xFF800000> : vector<16xf32>
    %19 = vector.multi_reduction <maximumf>, %16, %cst_13 [1] : vector<16x128xf32> to vector<16xf32>
    %20 = vector.shape_cast %19 : vector<16xf32> to vector<16x1xf32>
    %21 = vector.broadcast %20 : vector<16x1xf32> to vector<16x128xf32>
    %22 = arith.subf %16, %21 : vector<16x128xf32>
    %23 = math.exp %22 : vector<16x128xf32>
    %cst_14 = arith.constant dense<0.000000e+00> : vector<16xf32>
    %24 = vector.multi_reduction <add>, %23, %cst_14 [1] : vector<16x128xf32> to vector<16xf32>
    %25 = vector.shape_cast %24 : vector<16xf32> to vector<16x1xf32>
    %26 = math.log %25 : vector<16x1xf32>
    %27 = arith.addf %20, %26 : vector<16x1xf32>
    %28 = arith.subf %20, %27 : vector<16x1xf32>
    %29 = math.exp %28 : vector<16x1xf32>
    %cst_15 = arith.constant 1.000000e+00 : f32
    %30 = vector.broadcast %cst_15 : f32 to vector<16x1xf32>
    %31 = arith.subf %30, %29 : vector<16x1xf32>
    %32 = arith.mulf %29, %31 : vector<16x1xf32>
    %33 = vector.broadcast %32 : vector<16x1xf32> to vector<16x128xf32>
    %34 = arith.mulf %10, %33 : vector<16x128xf32>
    %35 = arith.truncf %34 : vector<16x128xf32> to vector<16x128xbf16>
    %cst_16 = arith.constant dense<0.000000e+00> : vector<128x128xf32>
    %36 = tpu.matmul %35, %11, %cst_16 {dimension_numbers = #tpu.dot_dimension_numbers<[0], [0], [1], [1], [0, 1, 1, 1], [], []>} : vector<16x128xbf16>, vector<16x128xbf16>, vector<128x128xf32> -> vector<128x128xf32>
    %c0_17 = arith.constant 0 : index
    %c0_18 = arith.constant 0 : index
    %c0_19 = arith.constant 0 : index
    %37 = vector.load %arg8[%c0_17, %c0_18, %c0_19] : memref<1x128x128xf32, #tpu.memory_space<vmem>>, vector<1x128x128xf32>
    %38 = vector.shape_cast %37 : vector<1x128x128xf32> to vector<128x128xf32>
    %39 = arith.addf %38, %36 : vector<128x128xf32>
    %c0_20 = arith.constant 0 : index
    %c0_21 = arith.constant 0 : index
    %c0_22 = arith.constant 0 : index
    %40 = vector.load %arg8[%c0_20, %c0_21, %c0_22] : memref<1x128x128xf32, #tpu.memory_space<vmem>>, vector<1x128x128xf32>
    %41 = vector.shape_cast %40 : vector<1x128x128xf32> to vector<128x128xf32>
    %42 = vector.shape_cast %39 : vector<128x128xf32> to vector<1x128x128xf32>
    tpu.vector_store %arg8[%c0_20, %c0_21, %c0_22], %42 {strides = array<i32>} : memref<1x128x128xf32, #tpu.memory_space<vmem>>, vector<1x128x128xf32>,
    return
  }
  func.func @transform_0(%arg0: i32, %arg1: i32) -> (i32, i32) {
    %c1_i32 = arith.constant 1 : i32
    %0 = arith.muli %arg0, %c1_i32 : i32
    %1 = arith.addi %0, %arg1 : i32
    %c0_i32 = arith.constant 0 : i32
    %c0_i32_0 = arith.constant 0 : i32
    return %1, %c0_i32 : i32, i32
  }
  func.func @transform_1(%arg0: i32, %arg1: i32) -> (i32, i32) {
    %c0_i32 = arith.constant 0 : i32
    %c0_i32_0 = arith.constant 0 : i32
    %c0_i32_1 = arith.constant 0 : i32
    return %c0_i32, %c0_i32_0 : i32, i32
  }
  func.func @transform_2(%arg0: i32, %arg1: i32) -> (i32, i32) {
    %c0_i32 = arith.constant 0 : i32
    %c0_i32_0 = arith.constant 0 : i32
    %c0_i32_1 = arith.constant 0 : i32
    return %c0_i32, %c0_i32_0 : i32, i32
  }
  func.func @transform_3(%arg0: i32, %arg1: i32) -> (i32, i32) {
    %c0_i32 = arith.constant 0 : i32
    %c0_i32_0 = arith.constant 0 : i32
    %c0_i32_1 = arith.constant 0 : i32
    return %c0_i32, %c0_i32_0 : i32, i32
  }
  func.func @transform_4(%arg0: i32, %arg1: i32) -> (i32, i32) {
    %c0_i32 = arith.constant 0 : i32
    %c0_i32_0 = arith.constant 0 : i32
    %c0_i32_1 = arith.constant 0 : i32
    return %c0_i32, %c0_i32_0 : i32, i32
  }
  func.func @transform_5(%arg0: i32, %arg1: i32) -> (i32, i32) {
    %c1_i32 = arith.constant 1 : i32
    %0 = arith.muli %arg0, %c1_i32 : i32
    %1 = arith.addi %0, %arg1 : i32
    %c0_i32 = arith.constant 0 : i32
    %c0_i32_0 = arith.constant 0 : i32
    return %1, %c0_i32 : i32, i32
  }
  func.func @transform_6(%arg0: i32, %arg1: i32) -> (i32, i32, i32) {
    %c0_i32 = arith.constant 0 : i32
    %c0_i32_0 = arith.constant 0 : i32
    %c0_i32_1 = arith.constant 0 : i32
    return %arg0, %c0_i32, %c0_i32_0 : i32, i32, i32
  }
}

</mosaic_0001>

<bundles_post_ra>
// kernel: tpu_custom_call.1
= control target key start
LH: loop header
LB: loop body
LE: loop exit
PB: predicated region body
PF: predicated region fallthrough
CT: control target
= control target key end

     0   :  { %12 = vsyncpa [#allocation3], 0  ;;  %s1252_s0 = inlined_call_operand.hbm [shape: f32[16,32], index: 0, kind: input, shape index: {}]   ;;  %s1253_s1 = inlined_call_operand.hbm [shape: bf16[32,128], index: 1, kind: input, shape index: {}]   ;;  %s1254_s2 = inlined_call_operand.vmem [shape: f32[1,128], index: 2, kind: input, shape index: {}]   ;;  %s1255_s3 = inlined_call_operand.hbm [shape: bf16[128,128], index: 3, kind: input, shape index: {}]   ;;  %s1256_s4 = inlined_call_operand.vmem [shape: f32[1,128], index: 4, kind: input, shape index: {}]   ;;  %s1257_s5 = inlined_call_operand.hbm [shape: bf16[16,128], index: 5, kind: output, shape index: {0}]   ;;  %s1258_s6 = inlined_call_operand.hbm [shape: f32[1,128,128], index: 6, kind: output, shape index: {1}]  }
   0x1   :  { %13 = vsyncpa [#allocation6], 0 }
   0x2   :  { %14 = vsyncpa [#allocation4], 0 }
   0x3   :  { %15 = vsyncpa [#allocation10], 0  ;;  %s1030_s21 = smov [#allocation5]   ;;  %s912_s25 = scalar_lea.hbm %s1253_s1, 256 }
   0x4   :  { %s37_s22 = sshll.u32 %s1030_s21, 4  ;;  %p913_p0 = scmp.ne.s32.totalorder %s1253_s1, %s912_s25  ;;  %s38_s22 = int_to_ptr.vmem [resolvable:$true] %s37_s22 }
   0x5   :  { %p916_p1 = scmp.lt.u32.totalorder %s912_s25, %s1253_s1 }
   0x7   :  { %p918_p2 = pnand %p916_p1, %p913_p0 }
   0x9   :  { %921 = shalt.err (!%p918_p2)
}
   0xa   :  { %s922_s30 = scalar_lea.vmem %s38_s22, 256  ;;  %p927_p4 = scmp.lt.s32.totalorder %s38_s22, %s38_s22 }
   0xb   :  { %p923_p3 = scmp.ne.s32.totalorder %s38_s22, %s922_s30  ;;  %p928_p5 = scmp.lt.s32.totalorder %s922_s30, %s922_s30 }
   0xd   :  { %p929_p6 = por %p928_p5, %p927_p4 }
   0xf   :  { %p930_p7 = pnand %p929_p6, %p923_p3 }
  0x11   :  { %933 = shalt.err (!%p930_p7)
}
  0x12   :  { %s1031_s7 = smov 64   ;;  %s1032_s8 = smov 4  }
  0x13   :  { %43 = dma.hbm_to_vmem [thread:$0]  %s1253_s1, 256, %s38_s22, [#allocation6], %s1031_s7, %s1031_s7, %s1032_s8  }
  0x14   :  { %s1033_s11 = smov [#allocation2]   ;;  %s934_s15 = scalar_lea.hbm %s1252_s0, 256 }
  0x15   :  { %s25_s12 = sshll.u32 %s1033_s11, 4  ;;  %p935_p8 = scmp.ne.s32.totalorder %s1252_s0, %s934_s15  ;;  %s26_s12 = int_to_ptr.vmem [resolvable:$true] %s25_s12 }
  0x16   :  { %p938_p9 = scmp.lt.u32.totalorder %s934_s15, %s1252_s0 }
  0x18   :  { %p940_p10 = pnand %p938_p9, %p935_p8 }
  0x1a   :  { %943 = shalt.err (!%p940_p10)
}
  0x1b   :  { %s944_s20 = scalar_lea.vmem %s26_s12, 256  ;;  %p949_p12 = scmp.lt.s32.totalorder %s26_s12, %s26_s12 }
  0x1c   :  { %p945_p11 = scmp.ne.s32.totalorder %s26_s12, %s944_s20  ;;  %p950_p13 = scmp.lt.s32.totalorder %s944_s20, %s944_s20 }
  0x1e   :  { %p951_p0 = por %p950_p13, %p949_p12 }
  0x20   :  { %p952_p1 = pnand %p951_p0, %p945_p11 }
  0x22   :  { %955 = shalt.err (!%p952_p1)
}
  0x23   :  { %s1034_s1 = smov 128   ;;  %s1035_s21 = smov 8  }
  0x24   :  { %31 = dma.hbm_to_vmem [thread:$0]  %s1252_s0, 256, %s26_s12, [#allocation3], %s1034_s1, %s1034_s1, %s1035_s21  }
  0x25   :  { %s1036_s24 = smov [#allocation7]   ;;  %s956_s28 = scalar_lea.hbm %s1255_s3, 1024 }
  0x26   :  { %s51_s25 = sshll.u32 %s1036_s24, 4  ;;  %p957_p2 = scmp.ne.s32.totalorder %s1255_s3, %s956_s28  ;;  %s52_s25 = int_to_ptr.vmem [resolvable:$true] %s51_s25 }
  0x27   :  { %p960_p3 = scmp.lt.u32.totalorder %s956_s28, %s1255_s3 }
  0x29   :  { %p962_p4 = pnand %p960_p3, %p957_p2 }
  0x2b   :  { %965 = shalt.err (!%p962_p4)
}
  0x2c   :  { %s966_s11 = scalar_lea.vmem %s52_s25, 1024  ;;  %p971_p6 = scmp.lt.s32.totalorder %s52_s25, %s52_s25 }
  0x2d   :  { %p967_p5 = scmp.ne.s32.totalorder %s52_s25, %s966_s11  ;;  %p972_p7 = scmp.lt.s32.totalorder %s966_s11, %s966_s11 }
  0x2f   :  { %p973_p8 = por %p972_p7, %p971_p6 }
  0x31   :  { %p974_p9 = pnand %p973_p8, %p967_p5 }
  0x33   :  { %977 = shalt.err (!%p974_p9)
}
  0x34   :  { %57 = dma.hbm_to_vmem [thread:$0]  %s1255_s3, 1024, %s52_s25, [#allocation6], %s1031_s7, %s1031_s7, %s1032_s8  }
  0x35   :  { %1022 = dma.done.wait [#allocation3], 256  }
  0x36   :  { %1023 = vsyncadd [#allocation3], 4294967040 }
  0x37   :  { %1024 = dma.done.wait [#allocation6], 1280  }
  0x38   :  { %1025 = vsyncadd [#allocation6], 4294966016  ;;  %v1037_v0 = vmov 0.0   ;;  %vm1038_vm0 = vmmov 0   ;;  %v882_v1 = vld [vmem:[#allocation5] sm:$0xff]   ;;  %v883_v2 = vld [vmem:[#allocation5 + $0x8] sm:$0xff]  }
  0x39   :  { %810 = vmatprep.subr.bf16.mxu0 %v1037_v0  ;;  %814 = vmatprep.mubr.msk.bf16.mxu0 %vm1038_vm0, %v1037_v0  ;;  %v94_v3 = vld [vmem:[#allocation2] sm:$0xff]  ;;  %v95_v4 = vld [vmem:[#allocation2 + $0x8] sm:$0xff]  ;;  %vm120_vm1 = vcmask 261120   ;;  %v886_v8 = vld [vmem:[#allocation7 + $0x10] sm:$0xff]   ;;  %v1039_v39 = vmov 683565275  }
  0x3a   :  { %818 = vmatprep.subr.bf16.mxu1 %v1037_v0  ;;  %834 = vmatprep.mubr.msk.bf16.mxu1 %vm1038_vm0, %v1037_v0  ;;  %v96_v5 = vpack.c.bf16 %v95_v4, %v94_v3  ;;  %v884_v6 = vld [vmem:[#allocation7] sm:$0xff]   ;;  %v885_v7 = vld [vmem:[#allocation7 + $0x8] sm:$0xff]   ;;  %v887_v9 = vld [vmem:[#allocation7 + $0x18] sm:$0xff]   ;;  %v1040_v42 = vmov 2475754826  }
  0x3b   :  { %811 = vmatpush3.bf16.msra.mxu0 %v882_v1  ;;  %819 = vmatpush3.bf16.msra.mxu1 %v884_v6  ;;  %v888_v10 = vld [vmem:[#allocation7 + $0x20] sm:$0xff]   ;;  %v889_v11 = vld [vmem:[#allocation7 + $0x28] sm:$0xff]   ;;  %v890_v12 = vld [vmem:[#allocation7 + $0x30] sm:$0xff]   ;;  %v1041_v44 = vmov 2131351028  }
  0x3c   :  { %812 = vmatprep.subr.bf16.mxu0 %v1037_v0  ;;  %820 = vmatprep.subr.bf16.mxu1 %v1037_v0  ;;  %v891_v13 = vld [vmem:[#allocation7 + $0x38] sm:$0xff]   ;;  %v751_v14 = vld [vmem:[%s1254_s2] ss:$0 sm:$0xff]  ;;  %v1042_v46 = vmov 2102212464  }
  0x3d   :  { %v1043_v48 = vmov 920167782   ;;  %v1044_v55 = vmov 1326507024  }
  0x3f   :  { %813 = vmatpush3.bf16.msra.mxu0 %v883_v2  ;;  %821 = vmatpush3.bf16.msra.mxu1 %v885_v7 }
  0x40   :  { %822 = vmatprep.subr.bf16.mxu1 %v1037_v0 }
  0x42   :  { %815 = vmatmul.mubr.msk.bf16.vlgmr.msra.gmra.mrb[0].mxu0 %vm120_vm1, %v96_v5 }
  0x43   :  { %823 = vmatpush3.bf16.msra.mxu1 %v886_v8 }
  0x44   :  { %824 = vmatprep.subr.bf16.mxu1 %v1037_v0 }
  0x47   :  { %825 = vmatpush3.bf16.msra.mxu1 %v887_v9 }
  0x48   :  { %826 = vmatprep.subr.bf16.mxu1 %v1037_v0 }
  0x4b   :  { %827 = vmatpush3.bf16.msra.mxu1 %v888_v10 }
  0x4c   :  { %828 = vmatprep.subr.bf16.mxu1 %v1037_v0 }
  0x4f   :  { %829 = vmatpush3.bf16.msra.mxu1 %v889_v11 }
  0x50   :  { %830 = vmatprep.subr.bf16.mxu1 %v1037_v0 }
  0x53   :  { %831 = vmatpush3.bf16.msra.mxu1 %v890_v12 }
  0x54   :  { %832 = vmatprep.subr.bf16.mxu1 %v1037_v0 }
  0x57   :  { %833 = vmatpush3.bf16.msra.mxu1 %v891_v13 }
 0x115   :  { %v158_v15 = vpop.f32.mrb[0].mxu0 }
 0x116   :  { %v1130_v16 = vadd.f32 %v751_v14, %v158_v15  ;;  %v816_v17 = vpop.f32.mrb[1].mxu0 }
 0x117   :  { %v161_v18 = vpop.f32.mrb[2].mxu0 }
 0x118   :  { %v165_v19 = vand.u32 2147483647, %v1130_v16  ;;  %v168_v20 = vand.u32 2139095040, %v1130_v16  ;;  %v1134_v21 = vadd.f32 %v751_v14, %v161_v18  ;;  %v817_v22 = vpop.f32.mrb[3].mxu0  ;;  %vm167_vm1 = vcmp.lt.s32.totalorder %v1130_v16, 0 }
 0x11a   :  { %v169_v23 = vshrl.u32 %v168_v20, 23  ;;  %v172_v24 = vand.u32 8388607, %v165_v19  ;;  %v271_v25 = vand.u32 2139095040, %v1134_v21  ;;  %v268_v27 = vand.u32 2147483647, %v1134_v21 }
 0x11b   :  { %vm1183_vm0 = vcmp.le.f32.partialorder %v165_v19, 0.7853982 }
 0x11c   :  { %v755_v26 = vadd.s32 4294967169, %v169_v23  ;;  %v272_v28 = vshrl.u32 %v271_v25, 23  ;;  %v173_v30 = vor.u32 8388608, %v172_v24  ;;  %v275_v32 = vand.u32 8388607, %v268_v27 }
 0x11e   :  { %v175_v29 = vadd.s32 1, %v755_v26  ;;  %v759_v31 = vadd.s32 4294967169, %v272_v28  ;;  %v1142_v37 = vshll.u32 %v173_v30, 8  ;;  %v276_v41 = vor.u32 8388608, %v275_v32 }
 0x120   :  { %vm176_vm2 = vcmp.gt.s32.totalorder %v175_v29, 0  ;;  %v278_v34 = vadd.s32 1, %v759_v31  ;;  %v316_v10 = vshll.u32 %v276_v41, 8 }
 0x121   :  { %v177_v33 = vsel %vm176_vm2, %v175_v29, 0  ;;  %vm270_vm2 = vcmp.lt.s32.totalorder %v1134_v21, 0 }
 0x122   :  { %v178_v35 = vshrl.u32 %v177_v33, 5  ;;  %v179_v36 = vand.u32 31, %v177_v33  ;;  %vm279_vm3 = vcmp.gt.s32.totalorder %v278_v34, 0 }
 0x123   :  { %v280_v60 = vsel %vm279_vm3, %v278_v34, 0  ;;  %vm1196_vm3 = vcmp.le.f32.partialorder %v268_v27, 0.7853982 }
 0x124   :  { %v180_v38 = vsub.s32 32, %v179_v36  ;;  %v182_v40 = vshll.u32 %v1039_v39, %v179_v36  ;;  %v185_v43 = vshll.u32 %v1040_v42, %v179_v36  ;;  %v188_v45 = vshll.u32 %v1041_v44, %v179_v36 }
 0x125   :  { %v191_v47 = vshll.u32 %v1042_v46, %v179_v36  ;;  %v194_v49 = vshll.u32 %v1043_v48, %v179_v36  ;;  %vm197_vm4 = vcmp.lt.s32.totalorder %v178_v35, 1  ;;  %vm199_vm5 = vcmp.lt.s32.totalorder %v178_v35, 3 }
 0x126   :  { %v183_v50 = vshrl.u32 %v1040_v42, %v180_v38  ;;  %v186_v51 = vshrl.u32 %v1041_v44, %v180_v38  ;;  %v189_v52 = vshrl.u32 %v1042_v46, %v180_v38  ;;  %v181_v53 = vshrl.u32 %v1039_v39, %v180_v38 }
 0x127   :  { %v192_v54 = vshrl.u32 %v1043_v48, %v180_v38  ;;  %v195_v56 = vshrl.u32 %v1044_v55, %v180_v38  ;;  %vm200_vm6 = vcmp.lt.s32.totalorder %v178_v35, 4  ;;  %v282_v63 = vand.u32 31, %v280_v60 }
 0x128   :  { %v184_v57 = vor.u32 %v183_v50, %v182_v40  ;;  %v187_v58 = vor.u32 %v186_v51, %v185_v43  ;;  %v190_v59 = vor.u32 %v189_v52, %v188_v45  ;;  %vm198_vm7 = vcmp.lt.s32.totalorder %v178_v35, 2 }
 0x129   :  { %v193_v61 = vor.u32 %v192_v54, %v191_v47  ;;  %v196_v62 = vor.u32 %v195_v56, %v194_v49  ;;  %v283_v7 = vsub.s32 32, %v282_v63  ;;  %v281_v14 = vshrl.u32 %v280_v60, 5 }
 0x12a   :  { %v201_v0 = vsel %vm197_vm4, %v181_v53, %v184_v57  ;;  %v202_v1 = vsel %vm200_vm6, %v190_v59, 2102212464  ;;  %v205_v2 = vsel %vm197_vm4, %v184_v57, %v187_v58  ;;  %v209_v3 = vsel %vm197_vm4, %v187_v58, %v190_v59 }
 0x12b   :  { %v203_v4 = vsel %vm199_vm5, %v187_v58, %v202_v1  ;;  %v206_v5 = vsel %vm200_vm6, %v193_v61, 920167782  ;;  %v210_v6 = vsel %vm200_vm6, %v196_v62, 1326507024  ;;  %v285_v22 = vshll.u32 %v1039_v39, %v282_v63 }
 0x12c   :  { %v207_v8 = vsel %vm199_vm5, %v190_v59, %v206_v5  ;;  %v211_v9 = vsel %vm199_vm5, %v193_v61, %v210_v6  ;;  %v204_v11 = vsel %vm198_vm7, %v201_v0, %v203_v4  ;;  %v286_v23 = vshrl.u32 %v1040_v42, %v283_v7 }
 0x12d   :  { %v208_v12 = vsel %vm198_vm7, %v205_v2, %v207_v8  ;;  %v212_v13 = vsel %vm198_vm7, %v209_v3, %v211_v9  ;;  %v288_v24 = vshll.u32 %v1040_v42, %v282_v63  ;;  %v289_v25 = vshrl.u32 %v1041_v44, %v283_v7 }
 0x12e   :  { %v1154_v15 = vmul.u32.u64.low %v1142_v37, %v212_v13  ;;  %v1155_v17 = vmul.u32.u64.high %v1142_v37, %v212_v13, %v1154_v15  ;;  %v1158_v18 = vmul.u32.u64.low %v1142_v37, %v208_v12  ;;  %v1159_v20 = vmul.u32.u64.high %v1142_v37, %v208_v12, %v1158_v18 }
 0x12f   :  { %v291_v26 = vshll.u32 %v1041_v44, %v282_v63  ;;  %v292_v28 = vshrl.u32 %v1042_v46, %v283_v7  ;;  %v294_v29 = vshll.u32 %v1042_v46, %v282_v63  ;;  %v295_v30 = vshrl.u32 %v1043_v48, %v283_v7 }
 0x130   :  { %v287_v31 = vor.u32 %v286_v23, %v285_v22  ;;  %v290_v32 = vor.u32 %v289_v25, %v288_v24  ;;  %v297_v33 = vshll.u32 %v1043_v48, %v282_v63  ;;  %v298_v34 = vshrl.u32 %v1044_v55, %v283_v7 }
 0x131   :  { %v220_v35 = vmul.u32 %v1142_v37, %v204_v11  ;;  %vm222_vm8 = vc.u32 %v1155_v17, %v1158_v18  ;;  %v223_v36 = vadd.s32 1, %v1159_v20  ;;  %v293_v38 = vor.u32 %v292_v28, %v291_v26 }
 0x132   :  { %v284_v40 = vshrl.u32 %v1039_v39, %v283_v7  ;;  %v296_v41 = vor.u32 %v295_v30, %v294_v29  ;;  %v299_v42 = vor.u32 %v298_v34, %v297_v33  ;;  %vm300_vm9 = vcmp.lt.s32.totalorder %v281_v14, 1 }
 0x133   :  { %v224_v43 = vsel %vm222_vm8, %v223_v36, %v1159_v20  ;;  %vm302_vm10 = vcmp.lt.s32.totalorder %v281_v14, 3  ;;  %vm303_vm11 = vcmp.lt.s32.totalorder %v281_v14, 4  ;;  %v308_v44 = vsel %vm300_vm9, %v287_v31, %v290_v32 }
 0x134   :  { %v225_v45 = vadd.s32 %v224_v43, %v220_v35  ;;  %v305_v46 = vsel %vm303_vm11, %v293_v38, 2102212464  ;;  %v309_v47 = vsel %vm303_vm11, %v296_v41, 920167782  ;;  %v312_v37 = vsel %vm300_vm9, %v290_v32, %v293_v38 }
 0x135   :  { %vm301_vm12 = vcmp.lt.s32.totalorder %v281_v14, 2  ;;  %v304_v48 = vsel %vm300_vm9, %v284_v40, %v287_v31  ;;  %v310_v49 = vsel %vm302_vm10, %v293_v38, %v309_v47  ;;  %v313_v50 = vsel %vm303_vm11, %v299_v42, 1326507024 }
 0x136   :  { %v226_v51 = vadd.s32 536870912, %v225_v45  ;;  %v306_v52 = vsel %vm302_vm10, %v290_v32, %v305_v46  ;;  %v311_v53 = vsel %vm301_vm12, %v308_v44, %v310_v49  ;;  %v314_v39 = vsel %vm302_vm10, %v296_v41, %v313_v50 }
 0x137   :  { %v315_v54 = vsel %vm301_vm12, %v312_v37, %v314_v39  ;;  %v1169_v55 = vmul.u32.u64.low %v316_v10, %v311_v53  ;;  %v1170_v56 = vmul.u32.u64.high %v316_v10, %v311_v53, %v1169_v55  ;;  %v307_v60 = vsel %vm301_vm12, %v304_v48, %v306_v52 }
 0x138   :  { %v227_v57 = vshrl.u32 %v226_v51, 30  ;;  %v1172_v58 = vmul.u32.u64.low %v316_v10, %v315_v54  ;;  %v1173_v59 = vmul.u32.u64.high %v316_v10, %v315_v54, %v1172_v58  ;;  %v323_v0 = vmul.u32 %v316_v10, %v307_v60 }
 0x139   :  { %v326_v62 = vadd.s32 1, %v1170_v56  ;;  %v221_v13 = vadd.s32 %v1158_v18, %v1155_v17  ;;  %vm257_vm7 = vweird.f32 %v1130_v16  ;;  %vm360_vm11 = vweird.f32 %v1134_v21 }
 0x13a   :  { %v228_v61 = vshll.u32 %v227_v57, 30  ;;  %vm325_vm13 = vc.u32 %v1173_v59, %v1169_v55  ;;  %v324_v35 = vadd.s32 %v1169_v55, %v1173_v59  ;;  %v251_v46 = vsub.s32 4, %v227_v57 }
 0x13b   :  { %v327_v1 = vsel %vm325_vm13, %v326_v62, %v1170_v56  ;;  %vm543_vm12 = vcmask 130048  }
 0x13c   :  { %v229_v63 = vsub.s32 %v225_v45, %v228_v61  ;;  %v328_v3 = vadd.s32 %v327_v1, %v323_v0  ;;  %v252_v50 = vsel %vm167_vm1, %v251_v46, %v227_v57 }
 0x13d   :  { %v254_v51 = vsel %vm1183_vm0, 0, %v252_v50 }
 0x13e   :  { %v231_v2 = vsub.s32 0, %v229_v63  ;;  %v329_v5 = vadd.s32 536870912, %v328_v3  ;;  %v258_v54 = vand.u32 3, %v254_v51 }
 0x140   :  { %v756_v4 = vmin.u32 %v231_v2, %v229_v63  ;;  %v330_v7 = vshrl.u32 %v329_v5, 30  ;;  %vm263_vm4 = vcmp.eq.s32.totalorder %v258_v54, 2  ;;  %vm260_vm5 = vcmp.eq.s32.totalorder %v258_v54, 0 }
 0x141   :  { %vm259_vm6 = vcmp.lt.s32.totalorder %v258_v54, 2 }
 0x142   :  { %v233_v6 = vclz %v756_v4  ;;  %v331_v9 = vshll.u32 %v330_v7, 30  ;;  %v354_v55 = vsub.s32 4, %v330_v7 }
 0x144   :  { %v757_v8 = vadd.s32 4294967294, %v233_v6  ;;  %v332_v11 = vsub.s32 %v328_v3, %v331_v9  ;;  %v355_v61 = vsel %vm270_vm2, %v354_v55, %v330_v7 }
 0x145   :  { %v357_v0 = vsel %vm1196_vm3, 0, %v355_v61 }
 0x146   :  { %vm758_vm14 = vcmp.lt.s32.totalorder %v757_v8, 0  ;;  %v334_v15 = vsub.s32 0, %v332_v11  ;;  %v361_v2 = vand.u32 3, %v357_v0 }
 0x147   :  { %v236_v12 = vsel %vm758_vm14, 0, %v757_v8 }
 0x148   :  { %v237_v14 = vsub.s32 32, %v236_v12  ;;  %v241_v10 = vsub.s32 4294967266, %v236_v12  ;;  %v238_v20 = vshll.u32 %v229_v63, %v236_v12  ;;  %v760_v24 = vmin.u32 %v334_v15, %v332_v11  ;;  %v763_v12 = vld [vmem:[%s1256_s4] ss:$0 sm:$0xff]  ;;  %s1045_s4 = smov [#allocation8]  }
 0x149   :  { %vm366_vm8 = vcmp.eq.s32.totalorder %v361_v2, 2  ;;  %vm363_vm9 = vcmp.eq.s32.totalorder %v361_v2, 0  ;;  %vm362_vm10 = vcmp.lt.s32.totalorder %v361_v2, 2  ;;  %s722_s15 = sshll.u32 %s1045_s4, 4  ;;  %s723_s15 = int_to_ptr.vmem [resolvable:$true] %s722_s15 }
 0x14a   :  { %v239_v22 = vshrl.u32 %v221_v13, %v237_v14  ;;  %v242_v23 = vadd.s32 127, %v241_v10  ;;  %v336_v28 = vclz %v760_v24  ;;  %s978_s16 = scalar_lea.vmem %s723_s15, 128  ;;  %p983_p11 = scmp.lt.s32.totalorder %s723_s15, %s723_s15 }
 0x14b   :  { %p979_p10 = scmp.ne.s32.totalorder %s723_s15, %s978_s16  ;;  %p984_p12 = scmp.lt.s32.totalorder %s978_s16, %s978_s16 }
 0x14c   :  { %v240_v25 = vor.u32 %v239_v22, %v238_v20  ;;  %v243_v26 = vshll.u32 %v242_v23, 23  ;;  %v761_v30 = vadd.s32 4294967294, %v336_v28 }
 0x14d   :  { %p985_p13 = por %p984_p12, %p983_p11 }
 0x14e   :  { %v244_v29 = vor.u32 4788187, %v243_v26  ;;  %v247_v32 = vcvt.s32.f32 %v240_v25  ;;  %vm762_vm15 = vcmp.lt.s32.totalorder %v761_v30, 0 }
 0x14f   :  { %v339_v33 = vsel %vm762_vm15, 0, %v761_v30  ;;  %p986_p0 = pnand %p985_p13, %p979_p10 }
 0x150   :  { %v245_v31 = vand.u32 2147483647, %v244_v29  ;;  %v340_v17 = vsub.s32 32, %v339_v33  ;;  %v344_v18 = vsub.s32 4294967266, %v339_v33  ;;  %v341_v38 = vshll.u32 %v332_v11, %v339_v33 }
 0x152   :  { %v248_v34 = vmul.f32 %v247_v32, %v245_v31  ;;  %v342_v40 = vshrl.u32 %v324_v35, %v340_v17  ;;  %v345_v41 = vadd.s32 127, %v344_v18 }
 0x154   :  { %v249_v36 = vxor.u32 2147483648, %v248_v34  ;;  %v343_v44 = vor.u32 %v342_v40, %v341_v38  ;;  %v346_v45 = vshll.u32 %v345_v41, 23 }
 0x156   :  { %v250_v43 = vsel %vm167_vm1, %v249_v36, %v248_v34  ;;  %v347_v37 = vor.u32 4788187, %v346_v45  ;;  %v350_v49 = vcvt.s32.f32 %v343_v44 }
 0x157   :  { %v253_v47 = vsel %vm1183_vm0, %v1130_v16, %v250_v43 }
 0x158   :  { %892 = vcosq.f32 %v253_v47  ;;  %v348_v48 = vand.u32 2147483647, %v347_v37 }
 0x159   :  { %894 = vsinq.f32 %v253_v47 }
 0x15a   :  { %v351_v19 = vmul.f32 %v350_v49, %v348_v48 }
 0x15c   :  { %v352_v52 = vxor.u32 2147483648, %v351_v19 }
 0x15e   :  { %v353_v39 = vsel %vm270_vm2, %v352_v52, %v351_v19 }
 0x15f   :  { %v356_v56 = vsel %vm1196_vm3, %v1134_v21, %v353_v39 }
 0x160   :  { %896 = vcosq.f32 %v356_v56 }
 0x161   :  { %898 = vsinq.f32 %v356_v56 }
 0x162   :  { %v893_v57 = vpop.eup %892 }
 0x163   :  { %v895_v58 = vpop.eup %894  ;;  %v264_v59 = vxor.u32 2147483648, %v893_v57 }
 0x164   :  { %v261_v60 = vxor.u32 2147483648, %v895_v58 }
 0x165   :  { %v265_v27 = vsel %vm263_vm4, %v264_v59, %v895_v58 }
 0x166   :  { %v262_v62 = vsel %vm260_vm5, %v893_v57, %v261_v60 }
 0x167   :  { %v266_v63 = vsel %vm259_vm6, %v262_v62, %v265_v27 }
 0x168   :  { %v1206_v1 = vsel %vm257_vm7, nan, %v266_v63 }
 0x16a   :  { %v897_v3 = vpop.eup %896 }
 0x16b   :  { %v899_v4 = vpop.eup %898  ;;  %v367_v5 = vxor.u32 2147483648, %v897_v3 }
 0x16c   :  { %v364_v6 = vxor.u32 2147483648, %v899_v4 }
 0x16d   :  { %v368_v7 = vsel %vm366_vm8, %v367_v5, %v899_v4 }
 0x16e   :  { %v365_v8 = vsel %vm363_vm9, %v897_v3, %v364_v6 }
 0x16f   :  { %v369_v9 = vsel %vm362_vm10, %v365_v8, %v368_v7 }
 0x170   :  { %v370_v16 = vsel %vm360_vm11, nan, %v369_v9 }
 0x171   :  { %v371_v11 = vpack.c.bf16 %v370_v16, %v1206_v1 }
 0x173   :  { %835 = vmatmul.mubr.bf16.vlgmr.msra.gmra.mrb[0].mxu1 %v371_v11  ;;  %838 = vmatprep.subr.bf16.mxu0 %v371_v11 }
 0x174   :  { %839 = vmatpush3.bf16.msra.mxu0 %v371_v11 }
 0x246   :  { %v477_v13 = vpop.f32.mrb[0].mxu1 }
 0x247   :  { %v478_v14 = vadd.f32 %v763_v12, %v477_v13  ;;  %v836_v10 = vpop.f32.mrb[1].mxu1 }
 0x248   :  { %v480_v15 = vpop.f32.mrb[2].mxu1 }
 0x249   :  { %v481_v20 = vadd.f32 %v763_v12, %v480_v15  ;;  %494 = vmax.xlane.f32.xlu0 %v478_v14  ;;  %v837_v22 = vpop.f32.mrb[3].mxu1 }
 0x24b   :  { %v787_v23 = vpack.c.bf16 %v481_v20, %v478_v14 }
 0x24d   :  { %496 = vmax.xlane.f32.xlu0 %v481_v20  ;;  %788 = vst [vmem:[#allocation8] sm:$0xff] %v787_v23  }
 0x2d6   :  { %v495_v21 = vpop.xlane.xlu0 %494 }
 0x2d7   :  { %v498_v24 = vsub.f32 %v478_v14, %v495_v21 }
 0x2d9   :  { %v500_v25 = vmul.f32 1.442695, %v498_v24 }
 0x2da   :  { %v497_v26 = vpop.xlane.xlu0 %496 }
 0x2db   :  { %v499_v28 = vsub.f32 %v481_v20, %v497_v26  ;;  %900 = vpow2.f32 %v500_v25 }
 0x2dd   :  { %v502_v29 = vmul.f32 1.442695, %v499_v28 }
 0x2df   :  { %902 = vpow2.f32 %v502_v29 }
 0x2e5   :  { %v901_v30 = vpop.eup %900 }
 0x2e6   :  { %504 = vadd.xlane.f32.xlu1 %v901_v30 }
 0x2e9   :  { %v903_v31 = vpop.eup %902 }
 0x2ea   :  { %506 = vadd.xlane.f32.xlu1 %v903_v31 }
 0x373   :  { %v505_v32 = vpop.xlane.xlu1 %504 }
 0x374   :  { %904 = vlog2.f32 %v505_v32 }
 0x377   :  { %v507_v33 = vpop.xlane.xlu1 %506 }
 0x378   :  { %906 = vlog2.f32 %v507_v33 }
 0x37e   :  { %v905_v34 = vpop.eup %904 }
 0x37f   :  { %v509_v35 = vmul.f32 0.6931472, %v905_v34 }
 0x381   :  { %v512_v17 = vadd.f32 %v509_v35, %v495_v21 }
 0x382   :  { %v907_v18 = vpop.eup %906 }
 0x383   :  { %v514_v36 = vsub.f32 %v495_v21, %v512_v17  ;;  %v511_v38 = vmul.f32 0.6931472, %v907_v18 }
 0x385   :  { %v516_v40 = vmul.f32 1.442695, %v514_v36  ;;  %v513_v41 = vadd.f32 %v511_v38, %v497_v26 }
 0x387   :  { %908 = vpow2.f32 %v516_v40  ;;  %v515_v42 = vsub.f32 %v497_v26, %v513_v41 }
 0x389   :  { %v518_v43 = vmul.f32 1.442695, %v515_v42 }
 0x38b   :  { %910 = vpow2.f32 %v518_v43 }
 0x391   :  { %v909_v44 = vpop.eup %908 }
 0x392   :  { %v520_v45 = vsub.f32 1.0, %v909_v44 }
 0x394   :  { %v522_v37 = vmul.f32 %v909_v44, %v520_v45 }
 0x395   :  { %v911_v46 = vpop.eup %910 }
 0x396   :  { %v521_v47 = vsub.f32 1.0, %v911_v46  ;;  %v524_v49 = vmul.f32 %v522_v37, %v1206_v1 }
 0x398   :  { %v523_v48 = vmul.f32 %v911_v46, %v521_v47 }
 0x39a   :  { %v525_v50 = vmul.f32 %v523_v48, %v370_v16 }
 0x39c   :  { %v526_v19 = vpack.c.bf16 %v525_v50, %v524_v49 }
 0x39e   :  { %527 = vxpose.xlu0.c.b16.start.end [1/1] (short) %v526_v19, 128 }
 0x404   :  { %v535_v51 = vpop.trf.xlu0 }
 0x405   :  { %840 = vmatprep.mubr.msk.bf16.mxu0 %vm543_vm12, %v535_v51 }
 0x408   :  { %v536_v52 = vpop.trf.xlu0 }
 0x409   :  { %841 = vmatmul.mubr.msk.bf16.vlgmr.msra.gmra.mrb[4].mxu0 %vm543_vm12, %v536_v52 }
 0x40c   :  { %v537_v53 = vpop.trf.xlu0 }
 0x40d   :  { %844 = vmatprep.mubr.msk.bf16.mxu0 %vm543_vm12, %v537_v53 }
 0x410   :  { %v538_v39 = vpop.trf.xlu0 }
 0x411   :  { %845 = vmatmul.mubr.msk.bf16.gmra.mrb[8].mxu0 %vm543_vm12, %v538_v39 }
 0x414   :  { %v539_v54 = vpop.trf.xlu0 }
 0x415   :  { %848 = vmatprep.mubr.msk.bf16.mxu0 %vm543_vm12, %v539_v54 }
 0x418   :  { %v540_v55 = vpop.trf.xlu0 }
 0x419   :  { %849 = vmatmul.mubr.msk.bf16.gmra.mrb[12].mxu0 %vm543_vm12, %v540_v55 }
 0x41c   :  { %v541_v56 = vpop.trf.xlu0 }
 0x41d   :  { %852 = vmatprep.mubr.msk.bf16.mxu0 %vm543_vm12, %v541_v56 }
 0x420   :  { %v542_v57 = vpop.trf.xlu0 }
 0x421   :  { %853 = vmatmul.mubr.msk.bf16.gmra.mrb[16].mxu0 %vm543_vm12, %v542_v57 }
 0x422   :  { %989 = shalt.err (!%p986_p0)
}
 0x423   :  { %s990_s19 = scalar_lea.hbm %s1257_s5, 128 }
 0x424   :  { %p991_p1 = scmp.ne.s32.totalorder %s1257_s5, %s990_s19  ;;  %p994_p2 = scmp.lt.u32.totalorder %s990_s19, %s1257_s5 }
 0x426   :  { %p996_p3 = pnand %p994_p2, %p991_p1 }
 0x428   :  { %999 = shalt.err (!%p996_p3)
}
 0x429   :  { %728 = dma.vmem_to_hbm [thread:$0]  %s723_s15, 128, %s1257_s5, [#allocation4], %s1031_s7, %s1031_s7, %s1032_s8  }
 0x42a   :  { %s1046_s5 = smov [#allocation9]  }
 0x42b   :  { %s734_s7 = sshll.u32 %s1046_s5, 4  ;;  %s735_s7 = int_to_ptr.vmem [resolvable:$true] %s734_s7 }
 0x42c   :  { %s1000_s8 = scalar_lea.vmem %s735_s7, 2048  ;;  %p1005_p5 = scmp.lt.s32.totalorder %s735_s7, %s735_s7 }
 0x42d   :  { %p1001_p4 = scmp.ne.s32.totalorder %s735_s7, %s1000_s8  ;;  %p1006_p6 = scmp.lt.s32.totalorder %s1000_s8, %s1000_s8 }
 0x42f   :  { %p1007_p7 = por %p1006_p6, %p1005_p5 }
 0x431   :  { %p1008_p8 = pnand %p1007_p7, %p1001_p4 }
 0x4dc   :  { %v842_v58 = vpop.f32.mrb[4].mxu0 }
 0x4dd   :  { %v602_v59 = vpop.f32.mrb[5].mxu0  ;;  %699 = vst [vmem:[#allocation9 + $0x10] sm:$0xff] %v842_v58 }
 0x4de   :  { %v843_v60 = vpop.f32.mrb[6].mxu0  ;;  %697 = vst [vmem:[#allocation9] sm:$0xff] %v602_v59 }
 0x4df   :  { %v605_v61 = vpop.f32.mrb[7].mxu0  ;;  %700 = vst [vmem:[#allocation9 + $0x18] sm:$0xff] %v843_v60 }
 0x4e0   :  { %698 = vst [vmem:[#allocation9 + $0x8] sm:$0xff] %v605_v61 }
 0x4e4   :  { %v846_v27 = vpop.f32.mrb[8].mxu0 }
 0x4e5   :  { %v618_v62 = vpop.f32.mrb[9].mxu0  ;;  %703 = vst [vmem:[#allocation9 + $0x30] sm:$0xff] %v846_v27 }
 0x4e6   :  { %v847_v63 = vpop.f32.mrb[10].mxu0  ;;  %701 = vst [vmem:[#allocation9 + $0x20] sm:$0xff] %v618_v62 }
 0x4e7   :  { %v621_v0 = vpop.f32.mrb[11].mxu0  ;;  %704 = vst [vmem:[#allocation9 + $0x38] sm:$0xff] %v847_v63 }
 0x4e8   :  { %702 = vst [vmem:[#allocation9 + $0x28] sm:$0xff] %v621_v0 }
 0x4ec   :  { %v850_v1 = vpop.f32.mrb[12].mxu0 }
 0x4ed   :  { %v634_v2 = vpop.f32.mrb[13].mxu0  ;;  %707 = vst [vmem:[#allocation9 + $0x50] sm:$0xff] %v850_v1 }
 0x4ee   :  { %v851_v3 = vpop.f32.mrb[14].mxu0  ;;  %705 = vst [vmem:[#allocation9 + $0x40] sm:$0xff] %v634_v2 }
 0x4ef   :  { %v637_v4 = vpop.f32.mrb[15].mxu0  ;;  %708 = vst [vmem:[#allocation9 + $0x58] sm:$0xff] %v851_v3 }
 0x4f0   :  { %706 = vst [vmem:[#allocation9 + $0x48] sm:$0xff] %v637_v4 }
 0x4f4   :  { %v854_v5 = vpop.f32.mrb[16].mxu0 }
 0x4f5   :  { %v650_v6 = vpop.f32.mrb[17].mxu0  ;;  %711 = vst [vmem:[#allocation9 + $0x70] sm:$0xff] %v854_v5 }
 0x4f6   :  { %v855_v7 = vpop.f32.mrb[18].mxu0  ;;  %709 = vst [vmem:[#allocation9 + $0x60] sm:$0xff] %v650_v6 }
 0x4f7   :  { %v653_v8 = vpop.f32.mrb[19].mxu0  ;;  %712 = vst [vmem:[#allocation9 + $0x78] sm:$0xff] %v855_v7 }
 0x4f8   :  { %710 = vst [vmem:[#allocation9 + $0x68] sm:$0xff] %v653_v8 }
 0x4f9   :  { %1011 = shalt.err (!%p1008_p8)
}
 0x4fa   :  { %s1012_s29 = scalar_lea.hbm %s1258_s6, 2048 }
 0x4fb   :  { %p1013_p9 = scmp.ne.s32.totalorder %s1258_s6, %s1012_s29  ;;  %p1016_p10 = scmp.lt.u32.totalorder %s1012_s29, %s1258_s6 }
 0x4fd   :  { %p1018_p11 = pnand %p1016_p10, %p1013_p9 }
 0x4ff   :  { %1021 = shalt.err (!%p1018_p11)
}
 0x500   :  { %740 = dma.vmem_to_hbm [thread:$0]  %s735_s7, 2048, %s1258_s6, [#allocation10], %s1034_s1, %s1034_s1, %s1035_s21  }
 0x501   :  { %1026 = dma.done.wait [#allocation4], 128  }
 0x502   :  { %1027 = vsyncadd [#allocation4], 4294967168 }
 0x503   :  { %1028 = dma.done.wait [#allocation10], 2048  }
 0x504   :  { %1029 = vsyncadd [#allocation10], 4294965248 }
 0x505   :  { %747 = vsyncpa [#allocation3], 1 }
 0x506   :  { %748 = vsyncpa [#allocation6], 1 }
 0x507   :  { %749 = vsyncpa [#allocation4], 1 }
 0x508   :  { %750 = vsyncpa [#allocation10], 1 }

// kernel: tpu_custom_call.1
= control target key start
LH: loop header
LB: loop body
LE: loop exit
PB: predicated region body
PF: predicated region fallthrough
CT: control target
= control target key end

     0   :  { %12 = vsyncpa [#allocation3], 0  ;;  %s1252_s0 = inlined_call_operand.hbm [shape: f32[16,32], index: 0, kind: input, shape index: {}]   ;;  %s1253_s1 = inlined_call_operand.hbm [shape: bf16[32,128], index: 1, kind: input, shape index: {}]   ;;  %s1254_s2 = inlined_call_operand.vmem [shape: f32[1,128], index: 2, kind: input, shape index: {}]   ;;  %s1255_s3 = inlined_call_operand.hbm [shape: bf16[128,128], index: 3, kind: input, shape index: {}]   ;;  %s1256_s4 = inlined_call_operand.vmem [shape: f32[1,128], index: 4, kind: input, shape index: {}]   ;;  %s1257_s5 = inlined_call_operand.hbm [shape: bf16[16,128], index: 5, kind: output, shape index: {0}]   ;;  %s1258_s6 = inlined_call_operand.hbm [shape: f32[1,128,128], index: 6, kind: output, shape index: {1}]  }
   0x1   :  { %13 = vsyncpa [#allocation6], 0 }
   0x2   :  { %14 = vsyncpa [#allocation4], 0 }
   0x3   :  { %15 = vsyncpa [#allocation10], 0  ;;  %s1030_s21 = smov [#allocation5]   ;;  %s912_s25 = scalar_lea.hbm %s1253_s1, 256 }
   0x4   :  { %s37_s22 = sshll.u32 %s1030_s21, 4  ;;  %p913_p0 = scmp.ne.s32.totalorder %s1253_s1, %s912_s25  ;;  %s38_s22 = int_to_ptr.vmem [resolvable:$true] %s37_s22 }
   0x5   :  { %p916_p1 = scmp.lt.u32.totalorder %s912_s25, %s1253_s1 }
   0x7   :  { %p918_p2 = pnand %p916_p1, %p913_p0 }
   0x9   :  { %921 = shalt.err (!%p918_p2)
}
   0xa   :  { %s922_s30 = scalar_lea.vmem %s38_s22, 256  ;;  %p927_p4 = scmp.lt.s32.totalorder %s38_s22, %s38_s22 }
   0xb   :  { %p923_p3 = scmp.ne.s32.totalorder %s38_s22, %s922_s30  ;;  %p928_p5 = scmp.lt.s32.totalorder %s922_s30, %s922_s30 }
   0xd   :  { %p929_p6 = por %p928_p5, %p927_p4 }
   0xf   :  { %p930_p7 = pnand %p929_p6, %p923_p3 }
  0x11   :  { %933 = shalt.err (!%p930_p7)
}
  0x12   :  { %s1031_s7 = smov 64   ;;  %s1032_s8 = smov 4  }
  0x13   :  { %43 = dma.hbm_to_vmem [thread:$0]  %s1253_s1, 256, %s38_s22, [#allocation6], %s1031_s7, %s1031_s7, %s1032_s8  }
  0x14   :  { %s1033_s11 = smov [#allocation2]   ;;  %s934_s15 = scalar_lea.hbm %s1252_s0, 256 }
  0x15   :  { %s25_s12 = sshll.u32 %s1033_s11, 4  ;;  %p935_p8 = scmp.ne.s32.totalorder %s1252_s0, %s934_s15  ;;  %s26_s12 = int_to_ptr.vmem [resolvable:$true] %s25_s12 }
  0x16   :  { %p938_p9 = scmp.lt.u32.totalorder %s934_s15, %s1252_s0 }
  0x18   :  { %p940_p10 = pnand %p938_p9, %p935_p8 }
  0x1a   :  { %943 = shalt.err (!%p940_p10)
}
  0x1b   :  { %s944_s20 = scalar_lea.vmem %s26_s12, 256  ;;  %p949_p12 = scmp.lt.s32.totalorder %s26_s12, %s26_s12 }
  0x1c   :  { %p945_p11 = scmp.ne.s32.totalorder %s26_s12, %s944_s20  ;;  %p950_p13 = scmp.lt.s32.totalorder %s944_s20, %s944_s20 }
  0x1e   :  { %p951_p0 = por %p950_p13, %p949_p12 }
  0x20   :  { %p952_p1 = pnand %p951_p0, %p945_p11 }
  0x22   :  { %955 = shalt.err (!%p952_p1)
}
  0x23   :  { %s1034_s1 = smov 128   ;;  %s1035_s21 = smov 8  }
  0x24   :  { %31 = dma.hbm_to_vmem [thread:$0]  %s1252_s0, 256, %s26_s12, [#allocation3], %s1034_s1, %s1034_s1, %s1035_s21  }
  0x25   :  { %s1036_s24 = smov [#allocation7]   ;;  %s956_s28 = scalar_lea.hbm %s1255_s3, 1024 }
  0x26   :  { %s51_s25 = sshll.u32 %s1036_s24, 4  ;;  %p957_p2 = scmp.ne.s32.totalorder %s1255_s3, %s956_s28  ;;  %s52_s25 = int_to_ptr.vmem [resolvable:$true] %s51_s25 }
  0x27   :  { %p960_p3 = scmp.lt.u32.totalorder %s956_s28, %s1255_s3 }
  0x29   :  { %p962_p4 = pnand %p960_p3, %p957_p2 }
  0x2b   :  { %965 = shalt.err (!%p962_p4)
}
  0x2c   :  { %s966_s11 = scalar_lea.vmem %s52_s25, 1024  ;;  %p971_p6 = scmp.lt.s32.totalorder %s52_s25, %s52_s25 }
  0x2d   :  { %p967_p5 = scmp.ne.s32.totalorder %s52_s25, %s966_s11  ;;  %p972_p7 = scmp.lt.s32.totalorder %s966_s11, %s966_s11 }
  0x2f   :  { %p973_p8 = por %p972_p7, %p971_p6 }
  0x31   :  { %p974_p9 = pnand %p973_p8, %p967_p5 }
  0x33   :  { %977 = shalt.err (!%p974_p9)
}
  0x34   :  { %57 = dma.hbm_to_vmem [thread:$0]  %s1255_s3, 1024, %s52_s25, [#allocation6], %s1031_s7, %s1031_s7, %s1032_s8  }
  0x35   :  { %1022 = dma.done.wait [#allocation3], 256  }
  0x36   :  { %1023 = vsyncadd [#allocation3], 4294967040 }
  0x37   :  { %1024 = dma.done.wait [#allocation6], 1280  }
  0x38   :  { %1025 = vsyncadd [#allocation6], 4294966016  ;;  %v1037_v0 = vmov 0.0   ;;  %vm1038_vm0 = vmmov 0   ;;  %v882_v1 = vld [vmem:[#allocation5] sm:$0xff]   ;;  %v883_v2 = vld [vmem:[#allocation5 + $0x8] sm:$0xff]  }
  0x39   :  { %810 = vmatprep.subr.bf16.mxu0 %v1037_v0  ;;  %814 = vmatprep.mubr.msk.bf16.mxu0 %vm1038_vm0, %v1037_v0  ;;  %v94_v3 = vld [vmem:[#allocation2] sm:$0xff]  ;;  %v95_v4 = vld [vmem:[#allocation2 + $0x8] sm:$0xff]  ;;  %vm120_vm1 = vcmask 261120   ;;  %v886_v8 = vld [vmem:[#allocation7 + $0x10] sm:$0xff]   ;;  %v1039_v39 = vmov 683565275  }
  0x3a   :  { %818 = vmatprep.subr.bf16.mxu1 %v1037_v0  ;;  %834 = vmatprep.mubr.msk.bf16.mxu1 %vm1038_vm0, %v1037_v0  ;;  %v96_v5 = vpack.c.bf16 %v95_v4, %v94_v3  ;;  %v884_v6 = vld [vmem:[#allocation7] sm:$0xff]   ;;  %v885_v7 = vld [vmem:[#allocation7 + $0x8] sm:$0xff]   ;;  %v887_v9 = vld [vmem:[#allocation7 + $0x18] sm:$0xff]   ;;  %v1040_v42 = vmov 2475754826  }
  0x3b   :  { %811 = vmatpush3.bf16.msra.mxu0 %v882_v1  ;;  %819 = vmatpush3.bf16.msra.mxu1 %v884_v6  ;;  %v888_v10 = vld [vmem:[#allocation7 + $0x20] sm:$0xff]   ;;  %v889_v11 = vld [vmem:[#allocation7 + $0x28] sm:$0xff]   ;;  %v890_v12 = vld [vmem:[#allocation7 + $0x30] sm:$0xff]   ;;  %v1041_v44 = vmov 2131351028  }
  0x3c   :  { %812 = vmatprep.subr.bf16.mxu0 %v1037_v0  ;;  %820 = vmatprep.subr.bf16.mxu1 %v1037_v0  ;;  %v891_v13 = vld [vmem:[#allocation7 + $0x38] sm:$0xff]   ;;  %v751_v14 = vld [vmem:[%s1254_s2] ss:$0 sm:$0xff]  ;;  %v1042_v46 = vmov 2102212464  }
  0x3d   :  { %v1043_v48 = vmov 920167782   ;;  %v1044_v55 = vmov 1326507024  }
  0x3f   :  { %813 = vmatpush3.bf16.msra.mxu0 %v883_v2  ;;  %821 = vmatpush3.bf16.msra.mxu1 %v885_v7 }
  0x40   :  { %822 = vmatprep.subr.bf16.mxu1 %v1037_v0 }
  0x42   :  { %815 = vmatmul.mubr.msk.bf16.vlgmr.msra.gmra.mrb[0].mxu0 %vm120_vm1, %v96_v5 }
  0x43   :  { %823 = vmatpush3.bf16.msra.mxu1 %v886_v8 }
  0x44   :  { %824 = vmatprep.subr.bf16.mxu1 %v1037_v0 }
  0x47   :  { %825 = vmatpush3.bf16.msra.mxu1 %v887_v9 }
  0x48   :  { %826 = vmatprep.subr.bf16.mxu1 %v1037_v0 }
  0x4b   :  { %827 = vmatpush3.bf16.msra.mxu1 %v888_v10 }
  0x4c   :  { %828 = vmatprep.subr.bf16.mxu1 %v1037_v0 }
  0x4f   :  { %829 = vmatpush3.bf16.msra.mxu1 %v889_v11 }
  0x50   :  { %830 = vmatprep.subr.bf16.mxu1 %v1037_v0 }
  0x53   :  { %831 = vmatpush3.bf16.msra.mxu1 %v890_v12 }
  0x54   :  { %832 = vmatprep.subr.bf16.mxu1 %v1037_v0 }
  0x57   :  { %833 = vmatpush3.bf16.msra.mxu1 %v891_v13 }
 0x115   :  { %v158_v15 = vpop.f32.mrb[0].mxu0 }
 0x116   :  { %v1130_v16 = vadd.f32 %v751_v14, %v158_v15  ;;  %v816_v17 = vpop.f32.mrb[1].mxu0 }
 0x117   :  { %v161_v18 = vpop.f32.mrb[2].mxu0 }
 0x118   :  { %v165_v19 = vand.u32 2147483647, %v1130_v16  ;;  %v168_v20 = vand.u32 2139095040, %v1130_v16  ;;  %v1134_v21 = vadd.f32 %v751_v14, %v161_v18  ;;  %v817_v22 = vpop.f32.mrb[3].mxu0  ;;  %vm167_vm1 = vcmp.lt.s32.totalorder %v1130_v16, 0 }
 0x11a   :  { %v169_v23 = vshrl.u32 %v168_v20, 23  ;;  %v172_v24 = vand.u32 8388607, %v165_v19  ;;  %v271_v25 = vand.u32 2139095040, %v1134_v21  ;;  %v268_v27 = vand.u32 2147483647, %v1134_v21 }
 0x11b   :  { %vm1183_vm0 = vcmp.le.f32.partialorder %v165_v19, 0.7853982 }
 0x11c   :  { %v755_v26 = vadd.s32 4294967169, %v169_v23  ;;  %v272_v28 = vshrl.u32 %v271_v25, 23  ;;  %v173_v30 = vor.u32 8388608, %v172_v24  ;;  %v275_v32 = vand.u32 8388607, %v268_v27 }
 0x11e   :  { %v175_v29 = vadd.s32 1, %v755_v26  ;;  %v759_v31 = vadd.s32 4294967169, %v272_v28  ;;  %v1142_v37 = vshll.u32 %v173_v30, 8  ;;  %v276_v41 = vor.u32 8388608, %v275_v32 }
 0x120   :  { %vm176_vm2 = vcmp.gt.s32.totalorder %v175_v29, 0  ;;  %v278_v34 = vadd.s32 1, %v759_v31  ;;  %v316_v10 = vshll.u32 %v276_v41, 8 }
 0x121   :  { %v177_v33 = vsel %vm176_vm2, %v175_v29, 0  ;;  %vm270_vm2 = vcmp.lt.s32.totalorder %v1134_v21, 0 }
 0x122   :  { %v178_v35 = vshrl.u32 %v177_v33, 5  ;;  %v179_v36 = vand.u32 31, %v177_v33  ;;  %vm279_vm3 = vcmp.gt.s32.totalorder %v278_v34, 0 }
 0x123   :  { %v280_v60 = vsel %vm279_vm3, %v278_v34, 0  ;;  %vm1196_vm3 = vcmp.le.f32.partialorder %v268_v27, 0.7853982 }
 0x124   :  { %v180_v38 = vsub.s32 32, %v179_v36  ;;  %v182_v40 = vshll.u32 %v1039_v39, %v179_v36  ;;  %v185_v43 = vshll.u32 %v1040_v42, %v179_v36  ;;  %v188_v45 = vshll.u32 %v1041_v44, %v179_v36 }
 0x125   :  { %v191_v47 = vshll.u32 %v1042_v46, %v179_v36  ;;  %v194_v49 = vshll.u32 %v1043_v48, %v179_v36  ;;  %vm197_vm4 = vcmp.lt.s32.totalorder %v178_v35, 1  ;;  %vm199_vm5 = vcmp.lt.s32.totalorder %v178_v35, 3 }
 0x126   :  { %v183_v50 = vshrl.u32 %v1040_v42, %v180_v38  ;;  %v186_v51 = vshrl.u32 %v1041_v44, %v180_v38  ;;  %v189_v52 = vshrl.u32 %v1042_v46, %v180_v38  ;;  %v181_v53 = vshrl.u32 %v1039_v39, %v180_v38 }
 0x127   :  { %v192_v54 = vshrl.u32 %v1043_v48, %v180_v38  ;;  %v195_v56 = vshrl.u32 %v1044_v55, %v180_v38  ;;  %vm200_vm6 = vcmp.lt.s32.totalorder %v178_v35, 4  ;;  %v282_v63 = vand.u32 31, %v280_v60 }
 0x128   :  { %v184_v57 = vor.u32 %v183_v50, %v182_v40  ;;  %v187_v58 = vor.u32 %v186_v51, %v185_v43  ;;  %v190_v59 = vor.u32 %v189_v52, %v188_v45  ;;  %vm198_vm7 = vcmp.lt.s32.totalorder %v178_v35, 2 }
 0x129   :  { %v193_v61 = vor.u32 %v192_v54, %v191_v47  ;;  %v196_v62 = vor.u32 %v195_v56, %v194_v49  ;;  %v283_v7 = vsub.s32 32, %v282_v63  ;;  %v281_v14 = vshrl.u32 %v280_v60, 5 }
 0x12a   :  { %v201_v0 = vsel %vm197_vm4, %v181_v53, %v184_v57  ;;  %v202_v1 = vsel %vm200_vm6, %v190_v59, 2102212464  ;;  %v205_v2 = vsel %vm197_vm4, %v184_v57, %v187_v58  ;;  %v209_v3 = vsel %vm197_vm4, %v187_v58, %v190_v59 }
 0x12b   :  { %v203_v4 = vsel %vm199_vm5, %v187_v58, %v202_v1  ;;  %v206_v5 = vsel %vm200_vm6, %v193_v61, 920167782  ;;  %v210_v6 = vsel %vm200_vm6, %v196_v62, 1326507024  ;;  %v285_v22 = vshll.u32 %v1039_v39, %v282_v63 }
 0x12c   :  { %v207_v8 = vsel %vm199_vm5, %v190_v59, %v206_v5  ;;  %v211_v9 = vsel %vm199_vm5, %v193_v61, %v210_v6  ;;  %v204_v11 = vsel %vm198_vm7, %v201_v0, %v203_v4  ;;  %v286_v23 = vshrl.u32 %v1040_v42, %v283_v7 }
 0x12d   :  { %v208_v12 = vsel %vm198_vm7, %v205_v2, %v207_v8  ;;  %v212_v13 = vsel %vm198_vm7, %v209_v3, %v211_v9  ;;  %v288_v24 = vshll.u32 %v1040_v42, %v282_v63  ;;  %v289_v25 = vshrl.u32 %v1041_v44, %v283_v7 }
 0x12e   :  { %v1154_v15 = vmul.u32.u64.low %v1142_v37, %v212_v13  ;;  %v1155_v17 = vmul.u32.u64.high %v1142_v37, %v212_v13, %v1154_v15  ;;  %v1158_v18 = vmul.u32.u64.low %v1142_v37, %v208_v12  ;;  %v1159_v20 = vmul.u32.u64.high %v1142_v37, %v208_v12, %v1158_v18 }
 0x12f   :  { %v291_v26 = vshll.u32 %v1041_v44, %v282_v63  ;;  %v292_v28 = vshrl.u32 %v1042_v46, %v283_v7  ;;  %v294_v29 = vshll.u32 %v1042_v46, %v282_v63  ;;  %v295_v30 = vshrl.u32 %v1043_v48, %v283_v7 }
 0x130   :  { %v287_v31 = vor.u32 %v286_v23, %v285_v22  ;;  %v290_v32 = vor.u32 %v289_v25, %v288_v24  ;;  %v297_v33 = vshll.u32 %v1043_v48, %v282_v63  ;;  %v298_v34 = vshrl.u32 %v1044_v55, %v283_v7 }
 0x131   :  { %v220_v35 = vmul.u32 %v1142_v37, %v204_v11  ;;  %vm222_vm8 = vc.u32 %v1155_v17, %v1158_v18  ;;  %v223_v36 = vadd.s32 1, %v1159_v20  ;;  %v293_v38 = vor.u32 %v292_v28, %v291_v26 }
 0x132   :  { %v284_v40 = vshrl.u32 %v1039_v39, %v283_v7  ;;  %v296_v41 = vor.u32 %v295_v30, %v294_v29  ;;  %v299_v42 = vor.u32 %v298_v34, %v297_v33  ;;  %vm300_vm9 = vcmp.lt.s32.totalorder %v281_v14, 1 }
 0x133   :  { %v224_v43 = vsel %vm222_vm8, %v223_v36, %v1159_v20  ;;  %vm302_vm10 = vcmp.lt.s32.totalorder %v281_v14, 3  ;;  %vm303_vm11 = vcmp.lt.s32.totalorder %v281_v14, 4  ;;  %v308_v44 = vsel %vm300_vm9, %v287_v31, %v290_v32 }
 0x134   :  { %v225_v45 = vadd.s32 %v224_v43, %v220_v35  ;;  %v305_v46 = vsel %vm303_vm11, %v293_v38, 2102212464  ;;  %v309_v47 = vsel %vm303_vm11, %v296_v41, 920167782  ;;  %v312_v37 = vsel %vm300_vm9, %v290_v32, %v293_v38 }
 0x135   :  { %vm301_vm12 = vcmp.lt.s32.totalorder %v281_v14, 2  ;;  %v304_v48 = vsel %vm300_vm9, %v284_v40, %v287_v31  ;;  %v310_v49 = vsel %vm302_vm10, %v293_v38, %v309_v47  ;;  %v313_v50 = vsel %vm303_vm11, %v299_v42, 1326507024 }
 0x136   :  { %v226_v51 = vadd.s32 536870912, %v225_v45  ;;  %v306_v52 = vsel %vm302_vm10, %v290_v32, %v305_v46  ;;  %v311_v53 = vsel %vm301_vm12, %v308_v44, %v310_v49  ;;  %v314_v39 = vsel %vm302_vm10, %v296_v41, %v313_v50 }
 0x137   :  { %v315_v54 = vsel %vm301_vm12, %v312_v37, %v314_v39  ;;  %v1169_v55 = vmul.u32.u64.low %v316_v10, %v311_v53  ;;  %v1170_v56 = vmul.u32.u64.high %v316_v10, %v311_v53, %v1169_v55  ;;  %v307_v60 = vsel %vm301_vm12, %v304_v48, %v306_v52 }
 0x138   :  { %v227_v57 = vshrl.u32 %v226_v51, 30  ;;  %v1172_v58 = vmul.u32.u64.low %v316_v10, %v315_v54  ;;  %v1173_v59 = vmul.u32.u64.high %v316_v10, %v315_v54, %v1172_v58  ;;  %v323_v0 = vmul.u32 %v316_v10, %v307_v60 }
 0x139   :  { %v326_v62 = vadd.s32 1, %v1170_v56  ;;  %v221_v13 = vadd.s32 %v1158_v18, %v1155_v17  ;;  %vm257_vm7 = vweird.f32 %v1130_v16  ;;  %vm360_vm11 = vweird.f32 %v1134_v21 }
 0x13a   :  { %v228_v61 = vshll.u32 %v227_v57, 30  ;;  %vm325_vm13 = vc.u32 %v1173_v59, %v1169_v55  ;;  %v324_v35 = vadd.s32 %v1169_v55, %v1173_v59  ;;  %v251_v46 = vsub.s32 4, %v227_v57 }
 0x13b   :  { %v327_v1 = vsel %vm325_vm13, %v326_v62, %v1170_v56  ;;  %vm543_vm12 = vcmask 130048  }
 0x13c   :  { %v229_v63 = vsub.s32 %v225_v45, %v228_v61  ;;  %v328_v3 = vadd.s32 %v327_v1, %v323_v0  ;;  %v252_v50 = vsel %vm167_vm1, %v251_v46, %v227_v57 }
 0x13d   :  { %v254_v51 = vsel %vm1183_vm0, 0, %v252_v50 }
 0x13e   :  { %v231_v2 = vsub.s32 0, %v229_v63  ;;  %v329_v5 = vadd.s32 536870912, %v328_v3  ;;  %v258_v54 = vand.u32 3, %v254_v51 }
 0x140   :  { %v756_v4 = vmin.u32 %v231_v2, %v229_v63  ;;  %v330_v7 = vshrl.u32 %v329_v5, 30  ;;  %vm263_vm4 = vcmp.eq.s32.totalorder %v258_v54, 2  ;;  %vm260_vm5 = vcmp.eq.s32.totalorder %v258_v54, 0 }
 0x141   :  { %vm259_vm6 = vcmp.lt.s32.totalorder %v258_v54, 2 }
 0x142   :  { %v233_v6 = vclz %v756_v4  ;;  %v331_v9 = vshll.u32 %v330_v7, 30  ;;  %v354_v55 = vsub.s32 4, %v330_v7 }
 0x144   :  { %v757_v8 = vadd.s32 4294967294, %v233_v6  ;;  %v332_v11 = vsub.s32 %v328_v3, %v331_v9  ;;  %v355_v61 = vsel %vm270_vm2, %v354_v55, %v330_v7 }
 0x145   :  { %v357_v0 = vsel %vm1196_vm3, 0, %v355_v61 }
 0x146   :  { %vm758_vm14 = vcmp.lt.s32.totalorder %v757_v8, 0  ;;  %v334_v15 = vsub.s32 0, %v332_v11  ;;  %v361_v2 = vand.u32 3, %v357_v0 }
 0x147   :  { %v236_v12 = vsel %vm758_vm14, 0, %v757_v8 }
 0x148   :  { %v237_v14 = vsub.s32 32, %v236_v12  ;;  %v241_v10 = vsub.s32 4294967266, %v236_v12  ;;  %v238_v20 = vshll.u32 %v229_v63, %v236_v12  ;;  %v760_v24 = vmin.u32 %v334_v15, %v332_v11  ;;  %v763_v12 = vld [vmem:[%s1256_s4] ss:$0 sm:$0xff]  ;;  %s1045_s4 = smov [#allocation8]  }
 0x149   :  { %vm366_vm8 = vcmp.eq.s32.totalorder %v361_v2, 2  ;;  %vm363_vm9 = vcmp.eq.s32.totalorder %v361_v2, 0  ;;  %vm362_vm10 = vcmp.lt.s32.totalorder %v361_v2, 2  ;;  %s722_s15 = sshll.u32 %s1045_s4, 4  ;;  %s723_s15 = int_to_ptr.vmem [resolvable:$true] %s722_s15 }
 0x14a   :  { %v239_v22 = vshrl.u32 %v221_v13, %v237_v14  ;;  %v242_v23 = vadd.s32 127, %v241_v10  ;;  %v336_v28 = vclz %v760_v24  ;;  %s978_s16 = scalar_lea.vmem %s723_s15, 128  ;;  %p983_p11 = scmp.lt.s32.totalorder %s723_s15, %s723_s15 }
 0x14b   :  { %p979_p10 = scmp.ne.s32.totalorder %s723_s15, %s978_s16  ;;  %p984_p12 = scmp.lt.s32.totalorder %s978_s16, %s978_s16 }
 0x14c   :  { %v240_v25 = vor.u32 %v239_v22, %v238_v20  ;;  %v243_v26 = vshll.u32 %v242_v23, 23  ;;  %v761_v30 = vadd.s32 4294967294, %v336_v28 }
 0x14d   :  { %p985_p13 = por %p984_p12, %p983_p11 }
 0x14e   :  { %v244_v29 = vor.u32 4788187, %v243_v26  ;;  %v247_v32 = vcvt.s32.f32 %v240_v25  ;;  %vm762_vm15 = vcmp.lt.s32.totalorder %v761_v30, 0 }
 0x14f   :  { %v339_v33 = vsel %vm762_vm15, 0, %v761_v30  ;;  %p986_p0 = pnand %p985_p13, %p979_p10 }
 0x150   :  { %v245_v31 = vand.u32 2147483647, %v244_v29  ;;  %v340_v17 = vsub.s32 32, %v339_v33  ;;  %v344_v18 = vsub.s32 4294967266, %v339_v33  ;;  %v341_v38 = vshll.u32 %v332_v11, %v339_v33 }
 0x152   :  { %v248_v34 = vmul.f32 %v247_v32, %v245_v31  ;;  %v342_v40 = vshrl.u32 %v324_v35, %v340_v17  ;;  %v345_v41 = vadd.s32 127, %v344_v18 }
 0x154   :  { %v249_v36 = vxor.u32 2147483648, %v248_v34  ;;  %v343_v44 = vor.u32 %v342_v40, %v341_v38  ;;  %v346_v45 = vshll.u32 %v345_v41, 23 }
 0x156   :  { %v250_v43 = vsel %vm167_vm1, %v249_v36, %v248_v34  ;;  %v347_v37 = vor.u32 4788187, %v346_v45  ;;  %v350_v49 = vcvt.s32.f32 %v343_v44 }
 0x157   :  { %v253_v47 = vsel %vm1183_vm0, %v1130_v16, %v250_v43 }
 0x158   :  { %892 = vcosq.f32 %v253_v47  ;;  %v348_v48 = vand.u32 2147483647, %v347_v37 }
 0x159   :  { %894 = vsinq.f32 %v253_v47 }
 0x15a   :  { %v351_v19 = vmul.f32 %v350_v49, %v348_v48 }
 0x15c   :  { %v352_v52 = vxor.u32 2147483648, %v351_v19 }
 0x15e   :  { %v353_v39 = vsel %vm270_vm2, %v352_v52, %v351_v19 }
 0x15f   :  { %v356_v56 = vsel %vm1196_vm3, %v1134_v21, %v353_v39 }
 0x160   :  { %896 = vcosq.f32 %v356_v56 }
 0x161   :  { %898 = vsinq.f32 %v356_v56 }
 0x162   :  { %v893_v57 = vpop.eup %892 }
 0x163   :  { %v895_v58 = vpop.eup %894  ;;  %v264_v59 = vxor.u32 2147483648, %v893_v57 }
 0x164   :  { %v261_v60 = vxor.u32 2147483648, %v895_v58 }
 0x165   :  { %v265_v27 = vsel %vm263_vm4, %v264_v59, %v895_v58 }
 0x166   :  { %v262_v62 = vsel %vm260_vm5, %v893_v57, %v261_v60 }
 0x167   :  { %v266_v63 = vsel %vm259_vm6, %v262_v62, %v265_v27 }
 0x168   :  { %v1206_v1 = vsel %vm257_vm7, nan, %v266_v63 }
 0x16a   :  { %v897_v3 = vpop.eup %896 }
 0x16b   :  { %v899_v4 = vpop.eup %898  ;;  %v367_v5 = vxor.u32 2147483648, %v897_v3 }
 0x16c   :  { %v364_v6 = vxor.u32 2147483648, %v899_v4 }
 0x16d   :  { %v368_v7 = vsel %vm366_vm8, %v367_v5, %v899_v4 }
 0x16e   :  { %v365_v8 = vsel %vm363_vm9, %v897_v3, %v364_v6 }
 0x16f   :  { %v369_v9 = vsel %vm362_vm10, %v365_v8, %v368_v7 }
 0x170   :  { %v370_v16 = vsel %vm360_vm11, nan, %v369_v9 }
 0x171   :  { %v371_v11 = vpack.c.bf16 %v370_v16, %v1206_v1 }
 0x173   :  { %835 = vmatmul.mubr.bf16.vlgmr.msra.gmra.mrb[0].mxu1 %v371_v11  ;;  %838 = vmatprep.subr.bf16.mxu0 %v371_v11 }
 0x174   :  { %839 = vmatpush3.bf16.msra.mxu0 %v371_v11 }
 0x246   :  { %v477_v13 = vpop.f32.mrb[0].mxu1 }
 0x247   :  { %v478_v14 = vadd.f32 %v763_v12, %v477_v13  ;;  %v836_v10 = vpop.f32.mrb[1].mxu1 }
 0x248   :  { %v480_v15 = vpop.f32.mrb[2].mxu1 }
 0x249   :  { %v481_v20 = vadd.f32 %v763_v12, %v480_v15  ;;  %494 = vmax.xlane.f32.xlu0 %v478_v14  ;;  %v837_v22 = vpop.f32.mrb[3].mxu1 }
 0x24b   :  { %v787_v23 = vpack.c.bf16 %v481_v20, %v478_v14 }
 0x24d   :  { %496 = vmax.xlane.f32.xlu0 %v481_v20  ;;  %788 = vst [vmem:[#allocation8] sm:$0xff] %v787_v23  }
 0x2d6   :  { %v495_v21 = vpop.xlane.xlu0 %494 }
 0x2d7   :  { %v498_v24 = vsub.f32 %v478_v14, %v495_v21 }
 0x2d9   :  { %v500_v25 = vmul.f32 1.442695, %v498_v24 }
 0x2da   :  { %v497_v26 = vpop.xlane.xlu0 %496 }
 0x2db   :  { %v499_v28 = vsub.f32 %v481_v20, %v497_v26  ;;  %900 = vpow2.f32 %v500_v25 }
 0x2dd   :  { %v502_v29 = vmul.f32 1.442695, %v499_v28 }
 0x2df   :  { %902 = vpow2.f32 %v502_v29 }
 0x2e5   :  { %v901_v30 = vpop.eup %900 }
 0x2e6   :  { %504 = vadd.xlane.f32.xlu1 %v901_v30 }
 0x2e9   :  { %v903_v31 = vpop.eup %902 }
 0x2ea   :  { %506 = vadd.xlane.f32.xlu1 %v903_v31 }
 0x373   :  { %v505_v32 = vpop.xlane.xlu1 %504 }
 0x374   :  { %904 = vlog2.f32 %v505_v32 }
 0x377   :  { %v507_v33 = vpop.xlane.xlu1 %506 }
 0x378   :  { %906 = vlog2.f32 %v507_v33 }
 0x37e   :  { %v905_v34 = vpop.eup %904 }
 0x37f   :  { %v509_v35 = vmul.f32 0.6931472, %v905_v34 }
 0x381   :  { %v512_v17 = vadd.f32 %v509_v35, %v495_v21 }
 0x382   :  { %v907_v18 = vpop.eup %906 }
 0x383   :  { %v514_v36 = vsub.f32 %v495_v21, %v512_v17  ;;  %v511_v38 = vmul.f32 0.6931472, %v907_v18 }
 0x385   :  { %v516_v40 = vmul.f32 1.442695, %v514_v36  ;;  %v513_v41 = vadd.f32 %v511_v38, %v497_v26 }
 0x387   :  { %908 = vpow2.f32 %v516_v40  ;;  %v515_v42 = vsub.f32 %v497_v26, %v513_v41 }
 0x389   :  { %v518_v43 = vmul.f32 1.442695, %v515_v42 }
 0x38b   :  { %910 = vpow2.f32 %v518_v43 }
 0x391   :  { %v909_v44 = vpop.eup %908 }
 0x392   :  { %v520_v45 = vsub.f32 1.0, %v909_v44 }
 0x394   :  { %v522_v37 = vmul.f32 %v909_v44, %v520_v45 }
 0x395   :  { %v911_v46 = vpop.eup %910 }
 0x396   :  { %v521_v47 = vsub.f32 1.0, %v911_v46  ;;  %v524_v49 = vmul.f32 %v522_v37, %v1206_v1 }
 0x398   :  { %v523_v48 = vmul.f32 %v911_v46, %v521_v47 }
 0x39a   :  { %v525_v50 = vmul.f32 %v523_v48, %v370_v16 }
 0x39c   :  { %v526_v19 = vpack.c.bf16 %v525_v50, %v524_v49 }
 0x39e   :  { %527 = vxpose.xlu0.c.b16.start.end [1/1] (short) %v526_v19, 128 }
 0x404   :  { %v535_v51 = vpop.trf.xlu0 }
 0x405   :  { %840 = vmatprep.mubr.msk.bf16.mxu0 %vm543_vm12, %v535_v51 }
 0x408   :  { %v536_v52 = vpop.trf.xlu0 }
 0x409   :  { %841 = vmatmul.mubr.msk.bf16.vlgmr.msra.gmra.mrb[4].mxu0 %vm543_vm12, %v536_v52 }
 0x40c   :  { %v537_v53 = vpop.trf.xlu0 }
 0x40d   :  { %844 = vmatprep.mubr.msk.bf16.mxu0 %vm543_vm12, %v537_v53 }
 0x410   :  { %v538_v39 = vpop.trf.xlu0 }
 0x411   :  { %845 = vmatmul.mubr.msk.bf16.gmra.mrb[8].mxu0 %vm543_vm12, %v538_v39 }
 0x414   :  { %v539_v54 = vpop.trf.xlu0 }
 0x415   :  { %848 = vmatprep.mubr.msk.bf16.mxu0 %vm543_vm12, %v539_v54 }
 0x418   :  { %v540_v55 = vpop.trf.xlu0 }
 0x419   :  { %849 = vmatmul.mubr.msk.bf16.gmra.mrb[12].mxu0 %vm543_vm12, %v540_v55 }
 0x41c   :  { %v541_v56 = vpop.trf.xlu0 }
 0x41d   :  { %852 = vmatprep.mubr.msk.bf16.mxu0 %vm543_vm12, %v541_v56 }
 0x420   :  { %v542_v57 = vpop.trf.xlu0 }
 0x421   :  { %853 = vmatmul.mubr.msk.bf16.gmra.mrb[16].mxu0 %vm543_vm12, %v542_v57 }
 0x422   :  { %989 = shalt.err (!%p986_p0)
}
 0x423   :  { %s990_s19 = scalar_lea.hbm %s1257_s5, 128 }
 0x424   :  { %p991_p1 = scmp.ne.s32.totalorder %s1257_s5, %s990_s19  ;;  %p994_p2 = scmp.lt.u32.totalorder %s990_s19, %s1257_s5 }
 0x426   :  { %p996_p3 = pnand %p994_p2, %p991_p1 }
 0x428   :  { %999 = shalt.err (!%p996_p3)
}
 0x429   :  { %728 = dma.vmem_to_hbm [thread:$0]  %s723_s15, 128, %s1257_s5, [#allocation4], %s1031_s7, %s1031_s7, %s1032_s8  }
 0x42a   :  { %s1046_s5 = smov [#allocation9]  }
 0x42b   :  { %s734_s7 = sshll.u32 %s1046_s5, 4  ;;  %s735_s7 = int_to_ptr.vmem [resolvable:$true] %s734_s7 }
 0x42c   :  { %s1000_s8 = scalar_lea.vmem %s735_s7, 2048  ;;  %p1005_p5 = scmp.lt.s32.totalorder %s735_s7, %s735_s7 }
 0x42d   :  { %p1001_p4 = scmp.ne.s32.totalorder %s735_s7, %s1000_s8  ;;  %p1006_p6 = scmp.lt.s32.totalorder %s1000_s8, %s1000_s8 }
 0x42f   :  { %p1007_p7 = por %p1006_p6, %p1005_p5 }
 0x431   :  { %p1008_p8 = pnand %p1007_p7, %p1001_p4 }
 0x4dc   :  { %v842_v58 = vpop.f32.mrb[4].mxu0 }
 0x4dd   :  { %v602_v59 = vpop.f32.mrb[5].mxu0  ;;  %699 = vst [vmem:[#allocation9 + $0x10] sm:$0xff] %v842_v58 }
 0x4de   :  { %v843_v60 = vpop.f32.mrb[6].mxu0  ;;  %697 = vst [vmem:[#allocation9] sm:$0xff] %v602_v59 }
 0x4df   :  { %v605_v61 = vpop.f32.mrb[7].mxu0  ;;  %700 = vst [vmem:[#allocation9 + $0x18] sm:$0xff] %v843_v60 }
 0x4e0   :  { %698 = vst [vmem:[#allocation9 + $0x8] sm:$0xff] %v605_v61 }
 0x4e4   :  { %v846_v27 = vpop.f32.mrb[8].mxu0 }
 0x4e5   :  { %v618_v62 = vpop.f32.mrb[9].mxu0  ;;  %703 = vst [vmem:[#allocation9 + $0x30] sm:$0xff] %v846_v27 }
 0x4e6   :  { %v847_v63 = vpop.f32.mrb[10].mxu0  ;;  %701 = vst [vmem:[#allocation9 + $0x20] sm:$0xff] %v618_v62 }
 0x4e7   :  { %v621_v0 = vpop.f32.mrb[11].mxu0  ;;  %704 = vst [vmem:[#allocation9 + $0x38] sm:$0xff] %v847_v63 }
 0x4e8   :  { %702 = vst [vmem:[#allocation9 + $0x28] sm:$0xff] %v621_v0 }
 0x4ec   :  { %v850_v1 = vpop.f32.mrb[12].mxu0 }
 0x4ed   :  { %v634_v2 = vpop.f32.mrb[13].mxu0  ;;  %707 = vst [vmem:[#allocation9 + $0x50] sm:$0xff] %v850_v1 }
 0x4ee   :  { %v851_v3 = vpop.f32.mrb[14].mxu0  ;;  %705 = vst [vmem:[#allocation9 + $0x40] sm:$0xff] %v634_v2 }
 0x4ef   :  { %v637_v4 = vpop.f32.mrb[15].mxu0  ;;  %708 = vst [vmem:[#allocation9 + $0x58] sm:$0xff] %v851_v3 }
 0x4f0   :  { %706 = vst [vmem:[#allocation9 + $0x48] sm:$0xff] %v637_v4 }
 0x4f4   :  { %v854_v5 = vpop.f32.mrb[16].mxu0 }
 0x4f5   :  { %v650_v6 = vpop.f32.mrb[17].mxu0  ;;  %711 = vst [vmem:[#allocation9 + $0x70] sm:$0xff] %v854_v5 }
 0x4f6   :  { %v855_v7 = vpop.f32.mrb[18].mxu0  ;;  %709 = vst [vmem:[#allocation9 + $0x60] sm:$0xff] %v650_v6 }
 0x4f7   :  { %v653_v8 = vpop.f32.mrb[19].mxu0  ;;  %712 = vst [vmem:[#allocation9 + $0x78] sm:$0xff] %v855_v7 }
 0x4f8   :  { %710 = vst [vmem:[#allocation9 + $0x68] sm:$0xff] %v653_v8 }
 0x4f9   :  { %1011 = shalt.err (!%p1008_p8)
}
 0x4fa   :  { %s1012_s29 = scalar_lea.hbm %s1258_s6, 2048 }
 0x4fb   :  { %p1013_p9 = scmp.ne.s32.totalorder %s1258_s6, %s1012_s29  ;;  %p1016_p10 = scmp.lt.u32.totalorder %s1012_s29, %s1258_s6 }
 0x4fd   :  { %p1018_p11 = pnand %p1016_p10, %p1013_p9 }
 0x4ff   :  { %1021 = shalt.err (!%p1018_p11)
}
 0x500   :  { %740 = dma.vmem_to_hbm [thread:$0]  %s735_s7, 2048, %s1258_s6, [#allocation10], %s1034_s1, %s1034_s1, %s1035_s21  }
 0x501   :  { %1026 = dma.done.wait [#allocation4], 128  }
 0x502   :  { %1027 = vsyncadd [#allocation4], 4294967168 }
 0x503   :  { %1028 = dma.done.wait [#allocation10], 2048  }
 0x504   :  { %1029 = vsyncadd [#allocation10], 4294965248 }
 0x505   :  { %747 = vsyncpa [#allocation3], 1 }
 0x506   :  { %748 = vsyncpa [#allocation6], 1 }
 0x507   :  { %749 = vsyncpa [#allocation4], 1 }
 0x508   :  { %750 = vsyncpa [#allocation10], 1 }

</bundles_post_ra>
